<compile_context>
chip_gen: v5e
topology: v5e:2x2
jax: 0.10.0
libtpu: 0.0.40
codegen_flags: <defaults>
</compile_context>

<pallas_src>
import jax
import jax.numpy as jnp
from jax.experimental import pallas as pl
from jax.experimental.pallas import tpu as pltpu


def _round_up(x, m):
    return ((x + m - 1) // m) * m


def _tensorcores_per_chip():
    """v7x exposes 2 TensorCores per chip; v5e/v6e have 1 (fallback: 1)."""
    try:
        kind = jax.devices()[0].device_kind.lower().replace(" ", "")
    except Exception:
        return 1
    return 2 if ("v7" in kind or "tpu7" in kind) else 1


def _cfconv_kernel(q_ref, mu_ref, w_in_ref, c1_ref, w1_ref, w2_ref, b2_ref, o_ref):
    mu = mu_ref[...]                                        # (TE, 1) f32

    # Stage 1 (MXU): one K=R matmul builds the whole extended operand in place:
    #   lanes [0:R)   = q0            (identity columns of w_in_ext)
    #   lanes [R:2R)  = mlp_in(q)     (pre-gate; bias b_in via c1 row 0)
    #   lane  2R      = 0             (mu is added below)
    #   lane  2R+1    = 1             (constant lane -> b1 folded into stage-2 weight)
    g = jnp.dot(q_ref[...], w_in_ref[...],
                preferred_element_type=jnp.float32) + c1_ref[0:1, :]      # (TE, Kp)

    # Gaussian RBF gate over the full width; coeff/offset rows are zero outside
    # [R:2R), so the gate is exactly exp(0) = 1 on all pass-through lanes.
    d = mu - c1_ref[1:2, :]
    gate = jnp.exp(c1_ref[2:3, :] * d * d)                                # (TE, Kp), EUP

    # Extended LHS [q0 | rbf*mlp_in(q) | mu | 1 | 0...]: no in-kernel concat,
    # mu enters via a rank-1 one-hot (c1 row 3) instead of a lane insert.
    lhs = (gate * g + mu * c1_ref[3:4, :]).astype(jnp.bfloat16)           # (TE, Kp)

    # Stage 2 (MXU): first mlp_out layer.  W1 rows for q0/_mu/mu plus the bias row
    # are pre-stacked in w1_ref, so bias b1 rides the matmul for free.
    h = jnp.dot(lhs, w1_ref[...], preferred_element_type=jnp.float32)     # (TE, H)

    # SiLU with the divide on the EUP (approx reciprocal), not the VALUs.
    h = h * pl.reciprocal(1.0 + jnp.exp(-h), approx=True)

    # Stage 3 (MXU): second mlp_out layer, N zero-padded to Hp -> unmasked vst.
    out = jnp.dot(h.astype(jnp.bfloat16), w2_ref[...],
                  preferred_element_type=jnp.float32) + b2_ref[...]       # (TE, Hp)
    o_ref[...] = out.astype(o_ref.dtype)


def cfconv_with_concat(q, mu, params, *, tile_e=2048):
    """q: (E, n_rbf) f32, mu: (E, 1) f32 -> (E, out_features) f32."""
    f32 = jnp.float32
    E, R = q.shape
    H = params["w2"].shape[0]
    Hp = _round_up(H, 128)                 # lane-dense output width
    Kp = _round_up(2 * R + 2, 128)         # extended LHS width: q0 | _mu | mu | 1 | pad

    # ---- tiling: big tiles amortize the ~0.35us/step overhead; split only when the
    # ---- chip actually has multiple TensorCores to feed (and then keep it balanced).
    cores = _tensorcores_per_chip()
    min_steps = 2 * cores if cores > 1 else 1
    te = min(tile_e, max(16, _round_up(pl.cdiv(E, min_steps), 16)))
    steps = pl.cdiv(E, te)
    if cores > 1:
        steps = _round_up(steps, cores)    # equal work on both v7x TensorCores
    E_pad = steps * te

    # ---- streamed inputs: q in bf16 (halves HBM bytes), mu stays f32 for the RBF.
    q_bf = q.astype(jnp.bfloat16)
    mu_f = mu.astype(f32)
    if E_pad != E:
        q_bf = jnp.pad(q_bf, ((0, E_pad - E), (0, 0)))
        mu_f = jnp.pad(mu_f, ((0, E_pad - E), (0, 0)))

    # ---- resident operands (pre-packed on the host) --------------------------------
    # Stage-1 weight: [ I_R | W_in | 0 ] so q0 and mlp_in(q) land at their final lanes.
    w_in_ext = jnp.zeros((R, Kp), f32)
    w_in_ext = w_in_ext.at[:, :R].set(jnp.eye(R, dtype=f32))
    w_in_ext = w_in_ext.at[:, R:2 * R].set(params["w_in"].astype(f32))
    w_in_ext = w_in_ext.astype(jnp.bfloat16)

    # Packed per-lane constants (4, Kp): [b_in_ext ; offsets ; coeff ; mu one-hot].
    b_in_ext = (jnp.zeros((Kp,), f32)
                .at[R:2 * R].set(params["b_in"].astype(f32).reshape(-1))
                .at[2 * R + 1].set(1.0))                       # constant-1 lane (-> b1)
    off_ext = jnp.zeros((Kp,), f32).at[R:2 * R].set(params["offsets"].astype(f32).reshape(-1))
    coeff = -0.5 / (params["widths"].astype(f32).reshape(-1) ** 2)
    coeff_ext = jnp.zeros((Kp,), f32).at[R:2 * R].set(coeff)   # 0 elsewhere -> exp(0)=1
    mu_onehot = jnp.zeros((Kp,), f32).at[2 * R].set(1.0)
    c1 = jnp.stack([b_in_ext, off_ext, coeff_ext, mu_onehot])  # (4, Kp)

    # Stage-2 weight: rows [W1_q0 ; W1_mu ; w1_d ; b1 ; 0] -> bias folded into the MXU.
    w1_ext = jnp.zeros((Kp, H), f32)
    w1_ext = (w1_ext.at[:R].set(params["w1_q0"].astype(f32))
                     .at[R:2 * R].set(params["w1_mu"].astype(f32))
                     .at[2 * R].set(params["w1_d"].astype(f32).reshape(-1))
                     .at[2 * R + 1].set(params["b1"].astype(f32).reshape(-1)))
    w1_ext = w1_ext.astype(jnp.bfloat16)

    # Stage-3 weight/bias, columns zero-padded to Hp (lane-dense stores).
    w2 = jnp.pad(params["w2"].astype(f32), ((0, 0), (0, Hp - H))).astype(jnp.bfloat16)
    b2 = jnp.pad(params["b2"].astype(f32), ((0, 0), (0, Hp - H)))          # (1, Hp)

    full = lambda i: (0, 0)
    cost = pl.CostEstimate(
        flops=2 * E_pad * (R * Kp + Kp * H + H * Hp),
        transcendentals=E_pad * (Kp + 2 * H),
        bytes_accessed=(2 * E_pad * R + 4 * E_pad + 4 * E_pad * Hp
                        + 2 * (R * Kp + Kp * H + H * Hp) + 4 * (4 * Kp + Hp)),
    )

    out = pl.pallas_call(
        _cfconv_kernel,
        out_shape=jax.ShapeDtypeStruct((E_pad, Hp), jnp.float32),
        grid=(steps,),
        in_specs=[
            pl.BlockSpec((te, R), lambda i: (i, 0)),   # q   (bf16, streamed)
            pl.BlockSpec((te, 1), lambda i: (i, 0)),   # mu  (f32, streamed)
            pl.BlockSpec((R, Kp), full),               # w_in_ext = [I | W_in | 0]
            pl.BlockSpec((4, Kp), full),               # c1: b_in / offsets / coeff / one-hot
            pl.BlockSpec((Kp, H), full),               # w1_ext = [W1_q0; W1_mu; w1_d; b1; 0]
            pl.BlockSpec((H, Hp), full),               # w2 (cols zero-padded)
            pl.BlockSpec((1, Hp), full),               # b2 (cols zero-padded)
        ],
        out_specs=pl.BlockSpec((te, Hp), lambda i: (i, 0)),
        compiler_params=pltpu.CompilerParams(
            dimension_semantics=("parallel",)),
        cost_estimate=cost,
    )(q_bf, mu_f, w_in_ext, c1, w1_ext, w2, b2)

    return out[:E, :H]


def make_params(key, n_rbf, out_features, cutoff=5.0):
    ks = jax.random.split(key, 6)
    R, H = n_rbf, out_features
    # GaussianRBF(n_rbf, cutoff=5.0): offsets = linspace(0, cutoff, n_rbf),
    # widths = spacing * ones (trainable init values).
    offsets = jnp.linspace(0.0, cutoff, R, dtype=jnp.float32).reshape(1, R)
    widths = jnp.full((1, R), cutoff / (R - 1), dtype=jnp.float32)
    # Deterministic synthetic weights (shapes match the nn.Linear layers).
    w_in = 0.1 * jax.random.normal(ks[0], (R, R), jnp.float32)
    b_in = 0.1 * jax.random.normal(ks[1], (1, R), jnp.float32)
    w1 = 0.1 * jax.random.normal(ks[2], (2 * R + 1, H), jnp.float32)
    b1 = 0.1 * jax.random.normal(ks[3], (1, H), jnp.float32)
    w2 = 0.1 * jax.random.normal(ks[4], (H, H), jnp.float32)
    b2 = 0.1 * jax.random.normal(ks[5], (1, H), jnp.float32)
    return {
        "w_in": w_in, "b_in": b_in,
        "offsets": offsets, "widths": widths,
        "w1_q0": w1[:R], "w1_mu": w1[R:2 * R], "w1_d": w1[2 * R:2 * R + 1],
        "b1": b1, "w2": w2, "b2": b2,
    }


def cfconv_reference(q, mu, p):
    """Pure-JAX (f32) reference of the PyTorch forward, for validation."""
    q0 = q
    q_in = q @ p["w_in"] + p["b_in"]
    coeff = -0.5 / (p["widths"] ** 2)
    rbf = jnp.exp(coeff * (mu - p["offsets"]) ** 2)
    _mu = rbf * q_in
    cat = jnp.concatenate([q0, _mu, mu], axis=-1)
    w1 = jnp.concatenate([p["w1_q0"], p["w1_mu"], p["w1_d"]], axis=0)
    h = cat @ w1 + p["b1"]
    h = h * jax.nn.sigmoid(h)
    return h @ p["w2"] + p["b2"]


if __name__ == "__main__":
    E = 256            # number of pairs/edges
    n_rbf = 32         # == in_features, per the module's mlp_in = Linear(n_rbf, n_rbf)
    out_features = 64

    key = jax.random.PRNGKey(0)
    kq, kmu, kp = jax.random.split(key, 3)
    q = jax.random.normal(kq, (E, n_rbf), jnp.float32)
    mu = 5.0 * jax.random.uniform(kmu, (E, 1), jnp.float32)   # distances in [0, cutoff)
    params = make_params(kp, n_rbf, out_features)

    out = cfconv_with_concat(q, mu, params)
    out = jax.block_until_ready(out)

    ref = cfconv_reference(q, mu, params)
    assert out.shape == (E, out_features)
    # bf16 matmul operands with f32 accumulation -> slightly looser tolerance vs f32 ref.
    assert jnp.allclose(out, ref, rtol=2e-2, atol=2e-2), "mismatch vs reference"
    print("KERNEL_OK")
</pallas_src>

<mosaic_0001>
module attributes {stable_mosaic.version = 11 : i64} {
  func.func @_cfconv_kernel(%arg0: i32, %arg1: memref<256x32xbf16, #tpu.memory_space<vmem>>, %arg2: memref<256x1xf32, #tpu.memory_space<vmem>>, %arg3: memref<32x128xbf16, #tpu.memory_space<vmem>>, %arg4: memref<4x128xf32, #tpu.memory_space<vmem>>, %arg5: memref<128x64xbf16, #tpu.memory_space<vmem>>, %arg6: memref<64x128xbf16, #tpu.memory_space<vmem>>, %arg7: memref<1x128xf32, #tpu.memory_space<vmem>>, %arg8: memref<256x128xf32, #tpu.memory_space<vmem>>) attributes {dimension_semantics = [#tpu.dimension_semantics<parallel>], iteration_bounds = array<i64: 1>, scalar_prefetch = 0 : i64, scratch_operands = 0 : i64, tpu.core_type = #tpu.core_type<tc>, window_params = [{transform_indices = @transform_0, window_bounds = array<i64: 256, 32>}, {transform_indices = @transform_1, window_bounds = array<i64: 256, 1>}, {pipeline_mode = #tpu.pipeline_mode<synchronous>, transform_indices = @transform_2, window_bounds = array<i64: 32, 128>}, {pipeline_mode = #tpu.pipeline_mode<synchronous>, transform_indices = @transform_3, window_bounds = array<i64: 4, 128>}, {pipeline_mode = #tpu.pipeline_mode<synchronous>, transform_indices = @transform_4, window_bounds = array<i64: 128, 64>}, {pipeline_mode = #tpu.pipeline_mode<synchronous>, transform_indices = @transform_5, window_bounds = array<i64: 64, 128>}, {pipeline_mode = #tpu.pipeline_mode<synchronous>, transform_indices = @transform_6, window_bounds = array<i64: 1, 128>}, {transform_indices = @transform_7, window_bounds = array<i64: 256, 128>}]} {
    %c0 = arith.constant 0 : index
    %c0_0 = arith.constant 0 : index
    %0 = vector.load %arg2[%c0, %c0_0] : memref<256x1xf32, #tpu.memory_space<vmem>>, vector<256x1xf32>
    %c0_1 = arith.constant 0 : index
    %c0_2 = arith.constant 0 : index
    %1 = vector.load %arg1[%c0_1, %c0_2] : memref<256x32xbf16, #tpu.memory_space<vmem>>, vector<256x32xbf16>
    %c0_3 = arith.constant 0 : index
    %c0_4 = arith.constant 0 : index
    %2 = vector.load %arg3[%c0_3, %c0_4] : memref<32x128xbf16, #tpu.memory_space<vmem>>, vector<32x128xbf16>
    %cst = arith.constant dense<0.000000e+00> : vector<256x128xf32>
    %3 = tpu.matmul %1, %2, %cst {dimension_numbers = #tpu.dot_dimension_numbers<[1], [0], [0], [1], [0, 0, 1, 1], [], []>} : vector<256x32xbf16>, vector<32x128xbf16>, vector<256x128xf32> -> vector<256x128xf32>
    %c0_5 = arith.constant 0 : index
    %c0_6 = arith.constant 0 : index
    %4 = vector.load %arg4[%c0_5, %c0_6] : memref<4x128xf32, #tpu.memory_space<vmem>>, vector<1x128xf32>
    %5 = vector.broadcast %4 : vector<1x128xf32> to vector<256x128xf32>
    %6 = arith.addf %3, %5 : vector<256x128xf32>
    %c1 = arith.constant 1 : index
    %c0_7 = arith.constant 0 : index
    %7 = vector.load %arg4[%c1, %c0_7] : memref<4x128xf32, #tpu.memory_space<vmem>>, vector<1x128xf32>
    %8 = vector.broadcast %0 : vector<256x1xf32> to vector<256x128xf32>
    %9 = vector.broadcast %7 : vector<1x128xf32> to vector<256x128xf32>
    %10 = arith.subf %8, %9 : vector<256x128xf32>
    %c2 = arith.constant 2 : index
    %c0_8 = arith.constant 0 : index
    %11 = vector.load %arg4[%c2, %c0_8] : memref<4x128xf32, #tpu.memory_space<vmem>>, vector<1x128xf32>
    %12 = vector.broadcast %11 : vector<1x128xf32> to vector<256x128xf32>
    %13 = arith.mulf %12, %10 : vector<256x128xf32>
    %14 = arith.mulf %13, %10 : vector<256x128xf32>
    %15 = math.exp %14 : vector<256x128xf32>
    %16 = arith.mulf %15, %6 : vector<256x128xf32>
    %c3 = arith.constant 3 : index
    %c0_9 = arith.constant 0 : index
    %17 = vector.load %arg4[%c3, %c0_9] : memref<4x128xf32, #tpu.memory_space<vmem>>, vector<1x128xf32>
    %18 = vector.broadcast %0 : vector<256x1xf32> to vector<256x128xf32>
    %19 = vector.broadcast %17 : vector<1x128xf32> to vector<256x128xf32>
    %20 = arith.mulf %18, %19 : vector<256x128xf32>
    %21 = arith.addf %16, %20 : vector<256x128xf32>
    %22 = arith.truncf %21 : vector<256x128xf32> to vector<256x128xbf16>
    %c0_10 = arith.constant 0 : index
    %c0_11 = arith.constant 0 : index
    %23 = vector.load %arg5[%c0_10, %c0_11] : memref<128x64xbf16, #tpu.memory_space<vmem>>, vector<128x64xbf16>
    %cst_12 = arith.constant dense<0.000000e+00> : vector<256x64xf32>
    %24 = tpu.matmul %22, %23, %cst_12 {dimension_numbers = #tpu.dot_dimension_numbers<[1], [0], [0], [1], [0, 0, 1, 1], [], []>} : vector<256x128xbf16>, vector<128x64xbf16>, vector<256x64xf32> -> vector<256x64xf32>
    %cst_13 = arith.constant 0.000000e+00 : f32
    %25 = vector.broadcast %cst_13 : f32 to vector<256x64xf32>
    %26 = arith.subf %25, %24 : vector<256x64xf32>
    %27 = math.exp %26 : vector<256x64xf32>
    %cst_14 = arith.constant 1.000000e+00 : f32
    %28 = vector.broadcast %cst_14 : f32 to vector<256x64xf32>
    %29 = arith.addf %28, %27 : vector<256x64xf32>
    %30 = tpu.reciprocal %29 {approx = true} : vector<256x64xf32> -> vector<256x64xf32>
    %31 = arith.mulf %24, %30 : vector<256x64xf32>
    %32 = arith.truncf %31 : vector<256x64xf32> to vector<256x64xbf16>
    %c0_15 = arith.constant 0 : index
    %c0_16 = arith.constant 0 : index
    %33 = vector.load %arg6[%c0_15, %c0_16] : memref<64x128xbf16, #tpu.memory_space<vmem>>, vector<64x128xbf16>
    %cst_17 = arith.constant dense<0.000000e+00> : vector<256x128xf32>
    %34 = tpu.matmul %32, %33, %cst_17 {dimension_numbers = #tpu.dot_dimension_numbers<[1], [0], [0], [1], [0, 0, 1, 1], [], []>} : vector<256x64xbf16>, vector<64x128xbf16>, vector<256x128xf32> -> vector<256x128xf32>
    %c0_18 = arith.constant 0 : index
    %c0_19 = arith.constant 0 : index
    %35 = vector.load %arg7[%c0_18, %c0_19] : memref<1x128xf32, #tpu.memory_space<vmem>>, vector<1x128xf32>
    %36 = vector.broadcast %35 : vector<1x128xf32> to vector<256x128xf32>
    %37 = arith.addf %34, %36 : vector<256x128xf32>
    %c0_20 = arith.constant 0 : index
    %c0_21 = arith.constant 0 : index
    %38 = vector.load %arg8[%c0_20, %c0_21] : memref<256x128xf32, #tpu.memory_space<vmem>>, vector<256x128xf32>
    tpu.vector_store %arg8[%c0_20, %c0_21], %37 {strides = array<i32>} : memref<256x128xf32, #tpu.memory_space<vmem>>, vector<256x128xf32>,
    return
  }
  func.func @transform_0(%arg0: i32) -> (i32, i32) {
    %c0_i32 = arith.constant 0 : i32
    %c0_i32_0 = arith.constant 0 : i32
    return %arg0, %c0_i32 : i32, i32
  }
  func.func @transform_1(%arg0: i32) -> (i32, i32) {
    %c0_i32 = arith.constant 0 : i32
    %c0_i32_0 = arith.constant 0 : i32
    return %arg0, %c0_i32 : i32, i32
  }
  func.func @transform_2(%arg0: i32) -> (i32, i32) {
    %c0_i32 = arith.constant 0 : i32
    %c0_i32_0 = arith.constant 0 : i32
    %c0_i32_1 = arith.constant 0 : i32
    return %c0_i32, %c0_i32_0 : i32, i32
  }
  func.func @transform_3(%arg0: i32) -> (i32, i32) {
    %c0_i32 = arith.constant 0 : i32
    %c0_i32_0 = arith.constant 0 : i32
    %c0_i32_1 = arith.constant 0 : i32
    return %c0_i32, %c0_i32_0 : i32, i32
  }
  func.func @transform_4(%arg0: i32) -> (i32, i32) {
    %c0_i32 = arith.constant 0 : i32
    %c0_i32_0 = arith.constant 0 : i32
    %c0_i32_1 = arith.constant 0 : i32
    return %c0_i32, %c0_i32_0 : i32, i32
  }
  func.func @transform_5(%arg0: i32) -> (i32, i32) {
    %c0_i32 = arith.constant 0 : i32
    %c0_i32_0 = arith.constant 0 : i32
    %c0_i32_1 = arith.constant 0 : i32
    return %c0_i32, %c0_i32_0 : i32, i32
  }
  func.func @transform_6(%arg0: i32) -> (i32, i32) {
    %c0_i32 = arith.constant 0 : i32
    %c0_i32_0 = arith.constant 0 : i32
    %c0_i32_1 = arith.constant 0 : i32
    return %c0_i32, %c0_i32_0 : i32, i32
  }
  func.func @transform_7(%arg0: i32) -> (i32, i32) {
    %c0_i32 = arith.constant 0 : i32
    %c0_i32_0 = arith.constant 0 : i32
    return %arg0, %c0_i32 : i32, i32
  }
}

</mosaic_0001>

<bundles_post_ra>
// kernel: tpu_custom_call.1
= control target key start
LH: loop header
LB: loop body
LE: loop exit
PB: predicated region body
PF: predicated region fallthrough
CT: control target
= control target key end

     0   :  { %v1779_v3 = vmov 0   ;;  %vm190_vm0 = vcmask 261120   ;;  %s2356_s0 = inlined_call_operand.vmem [shape: bf16[256,32], index: 0, kind: input, shape index: {}]   ;;  %s2357_s1 = inlined_call_operand.vmem [shape: f32[256,1], index: 1, kind: input, shape index: {}]   ;;  %s2358_s2 = inlined_call_operand.vmem [shape: bf16[32,128], index: 2, kind: input, shape index: {}]   ;;  %s2359_s3 = inlined_call_operand.vmem [shape: f32[4,128], index: 3, kind: input, shape index: {}]   ;;  %s2360_s4 = inlined_call_operand.vmem [shape: bf16[128,64], index: 4, kind: input, shape index: {}]   ;;  %s2361_s5 = inlined_call_operand.vmem [shape: bf16[64,128], index: 5, kind: input, shape index: {}]   ;;  %s2362_s6 = inlined_call_operand.vmem [shape: f32[1,128], index: 6, kind: input, shape index: {}]   ;;  %s2363_s7 = inlined_call_operand.hbm [shape: f32[256,128], index: 7, kind: output, shape index: {}]  }
   0x1   :  { %v30_v0 = vld [vmem:[%s2357_s1 + $0x10] sm:$0xff]  ;;  %v28_v1 = vld [vmem:[%s2357_s1] sm:$0xff]  ;;  %v1520_v2 = vld [vmem:[%s2358_s2 + $0x8] sm:$0xff]  ;;  %1552 = vset.pattern.permute.xlu1 %v1779_v3  ;;  %1551 = vset.pattern.permute.xlu0 %v1779_v3 }
   0x2   :  { %341 = vperm.xlu1 %1552, %v30_v0   ;;  %331 = vperm.xlu0 %1551, %v28_v1   ;;  %v1519_v4 = vld [vmem:[%s2358_s2] sm:$0xff]  ;;  %v31_v7 = vld [vmem:[%s2357_s1 + $0x18] sm:$0xff]  ;;  %v1516_v8 = vld [vmem:[%s2356_s0 + $0x68] sm:$0xff] }
   0x3   :  { %245 = vmatpush.bf16.msra.mxu0 %v1520_v2  ;;  %1533 = vmatpush.bf16.msra.mxu3 %v1520_v2  ;;  %v32_v5 = vld [vmem:[%s2357_s1 + $0x20] sm:$0xff] }
   0x4   :  { %1553 = vset.pattern.permute.xlu2 %v1779_v3  ;;  %v1503_v6 = vld [vmem:[%s2356_s0] sm:$0xff] }
   0x5   :  { %351 = vperm.xlu2 %1553, %v32_v5  }
   0x7   :  { %246 = vmatpush.bf16.msra.mxu0 %v1519_v4  ;;  %1534 = vmatpush.bf16.msra.mxu3 %v1519_v4 }
   0x8   :  { %12 = vsyncpa [#allocation3], 0  ;;  %v29_v9 = vld [vmem:[%s2357_s1 + $0x8] sm:$0xff]  ;;  %v35_v11 = vld [vmem:[%s2357_s1 + $0x38] sm:$0xff]  ;;  %vm1163_vm1 = vcmask 523264   ;;  %s1339_s15 = sshll.u32 %s2363_s7, 4  ;;  %s1340_s15 = int_to_ptr.hbm [resolvable:$true] %s1339_s15 }
   0x9   :  { %v33_v10 = vld [vmem:[%s2357_s1 + $0x28] sm:$0xff]  ;;  %v34_v12 = vld [vmem:[%s2357_s1 + $0x30] sm:$0xff]  ;;  %v36_v13 = vld [vmem:[%s2357_s1 + $0x40] sm:$0xff]  ;;  %s1781_s2 = smov 128   ;;  %s1782_s16 = smov 8  }
   0xa   :  { %1423 = vmatmul.msk.bf16.vlgmr.msra.gmra.mxu0 %vm190_vm0, %v1503_v6  ;;  %346 = vperm.xlu1 %1552, %v31_v7   ;;  %v1504_v14 = vld [vmem:[%s2356_s0 + $0x8] sm:$0xff]  ;;  %v38_v15 = vld [vmem:[%s2357_s1 + $0x50] sm:$0xff]  ;;  %v39_v18 = vld [vmem:[%s2357_s1 + $0x58] sm:$0xff] }
   0xb   :  { %336 = vperm.xlu0 %1551, %v29_v9   ;;  %1436 = vmatmul.msk.bf16.vlgmr.msra.gmra.mxu3 %vm190_vm0, %v1516_v8  ;;  %v1517_v16 = vld [vmem:[%s2356_s0 + $0x70] sm:$0xff]  ;;  %v37_v17 = vld [vmem:[%s2357_s1 + $0x48] sm:$0xff]  ;;  %v40_v20 = vld [vmem:[%s2357_s1 + $0x60] sm:$0xff] }
   0xc   :  { %v41_v19 = vld [vmem:[%s2357_s1 + $0x68] sm:$0xff]  ;;  %v50_v21 = vld [vmem:[%s2357_s1 + $0xb0] sm:$0xff]  ;;  %v1518_v24 = vld [vmem:[%s2356_s0 + $0x78] sm:$0xff] }
   0xd   :  { %356 = vperm.xlu2 %1553, %v33_v10   ;;  %v1505_v22 = vld [vmem:[%s2356_s0 + $0x10] sm:$0xff]  ;;  %v51_v25 = vld [vmem:[%s2357_s1 + $0xb8] sm:$0xff]  ;;  %v53_v27 = vld [vmem:[%s2357_s1 + $0xc8] sm:$0xff] }
   0xe   :  { %v42_v23 = vld [vmem:[%s2357_s1 + $0x70] sm:$0xff]  ;;  %v43_v26 = vld [vmem:[%s2357_s1 + $0x78] sm:$0xff]  ;;  %v52_v28 = vld [vmem:[%s2357_s1 + $0xc0] sm:$0xff] }
   0xf   :  { %v44_v29 = vld [vmem:[%s2357_s1 + $0x80] sm:$0xff]  ;;  %v1506_v30 = vld [vmem:[%s2356_s0 + $0x18] sm:$0xff]  ;;  %v54_v31 = vld [vmem:[%s2357_s1 + $0xd0] sm:$0xff] }
  0x10   :  { %v45_v32 = vld [vmem:[%s2357_s1 + $0x88] sm:$0xff]  ;;  %v55_v33 = vld [vmem:[%s2357_s1 + $0xd8] sm:$0xff]  ;;  %v46_v35 = vld [vmem:[%s2357_s1 + $0x90] sm:$0xff] }
  0x11   :  { %v47_v34 = vld [vmem:[%s2357_s1 + $0x98] sm:$0xff]  ;;  %v56_v36 = vld [vmem:[%s2357_s1 + $0xe0] sm:$0xff]  ;;  %v57_v39 = vld [vmem:[%s2357_s1 + $0xe8] sm:$0xff] }
  0x12   :  { %366 = vperm.xlu1 %1552, %v35_v11   ;;  %v1507_v37 = vld [vmem:[%s2356_s0 + $0x20] sm:$0xff]  ;;  %v59_v40 = vld [vmem:[%s2357_s1 + $0xf8] sm:$0xff]  ;;  %v58_v41 = vld [vmem:[%s2357_s1 + $0xf0] sm:$0xff] }
  0x13   :  { %361 = vperm.xlu0 %1551, %v34_v12   ;;  %v48_v38 = vld [vmem:[%s2357_s1 + $0xa0] sm:$0xff]  ;;  %v1508_v42 = vld [vmem:[%s2356_s0 + $0x28] sm:$0xff]  ;;  %v1528_v43 = vld [vmem:[%s2360_s4 + $0x38] sm:$0xff] }
  0x14   :  { %830 = vmatpush.bf16.msra.mxu1 %v1528_v43  ;;  %1535 = vmatpush.bf16.msrb.mxu3 %v1528_v43  ;;  %v1527_v44 = vld [vmem:[%s2360_s4 + $0x30] sm:$0xff]  ;;  %v1526_v46 = vld [vmem:[%s2360_s4 + $0x28] sm:$0xff]  ;;  %v1525_v48 = vld [vmem:[%s2360_s4 + $0x20] sm:$0xff] }
  0x15   :  { %371 = vperm.xlu2 %1553, %v36_v13   ;;  %v49_v47 = vld [vmem:[%s2357_s1 + $0xa8] sm:$0xff]  ;;  %v1509_v49 = vld [vmem:[%s2356_s0 + $0x30] sm:$0xff]  ;;  %v1524_v51 = vld [vmem:[%s2360_s4 + $0x18] sm:$0xff] }
  0x16   :  { %v1523_v52 = vld [vmem:[%s2360_s4 + $0x10] sm:$0xff]  ;;  %v1522_v54 = vld [vmem:[%s2360_s4 + $0x8] sm:$0xff]  ;;  %v1995_v55 = vld [vmem:[%s2359_s3 + $0x1] ss:$0 sm:$0xff] }
  0x17   :  { %v1521_v56 = vld [vmem:[%s2360_s4] sm:$0xff]  ;;  %v1510_v59 = vld [vmem:[%s2356_s0 + $0x38] sm:$0xff] }
  0x18   :  { %831 = vmatpush.bf16.msra.mxu1 %v1527_v44  ;;  %1536 = vmatpush.bf16.msrb.mxu3 %v1527_v44  ;;  %v2008_v60 = vld [vmem:[%s2359_s3 + $0x2] ss:$0 sm:$0xff]  ;;  %v2029_v13 = vld [vmem:[%s2359_s3] ss:$0 sm:$0xff] }
  0x19   :  { %v1511_v10 = vld [vmem:[%s2356_s0 + $0x40] sm:$0xff] }
  0x1a   :  { %1424 = vmatmul.msk.bf16.gmra.mxu0 %vm190_vm0, %v1504_v14  ;;  %381 = vperm.xlu1 %1552, %v38_v15  }
  0x1b   :  { %376 = vperm.xlu0 %1551, %v37_v17   ;;  %1437 = vmatmul.msk.bf16.gmra.mxu3 %vm190_vm0, %v1517_v16  ;;  %v2039_v17 = vld [vmem:[%s2359_s3 + $0x3] ss:$0 sm:$0xff] }
  0x1c   :  { %832 = vmatpush.bf16.msra.mxu1 %v1526_v46  ;;  %1537 = vmatpush.bf16.msrb.mxu3 %v1526_v46 }
  0x1d   :  { %386 = vperm.xlu2 %1553, %v39_v18  }
  0x20   :  { %833 = vmatpush.bf16.msra.mxu1 %v1525_v48  ;;  %1538 = vmatpush.bf16.msrb.mxu3 %v1525_v48 }
  0x22   :  { %396 = vperm.xlu1 %1552, %v41_v19  }
  0x23   :  { %391 = vperm.xlu0 %1551, %v40_v20  }
  0x24   :  { %834 = vmatpush.bf16.msra.mxu1 %v1524_v51  ;;  %1539 = vmatpush.bf16.msrb.mxu3 %v1524_v51 }
  0x25   :  { %441 = vperm.xlu2 %1553, %v50_v21  }
  0x28   :  { %835 = vmatpush.bf16.msra.mxu1 %v1523_v52  ;;  %1540 = vmatpush.bf16.msrb.mxu3 %v1523_v52 }
  0x2a   :  { %1425 = vmatmul.msk.bf16.gmra.mxu0 %vm190_vm0, %v1505_v22  ;;  %401 = vperm.xlu1 %1552, %v42_v23  }
  0x2b   :  { %446 = vperm.xlu0 %1551, %v51_v25   ;;  %1438 = vmatmul.msk.bf16.gmra.mxu3 %vm190_vm0, %v1518_v24 }
  0x2c   :  { %836 = vmatpush.bf16.msra.mxu1 %v1522_v54  ;;  %1541 = vmatpush.bf16.msrb.mxu3 %v1522_v54 }
  0x2d   :  { %406 = vperm.xlu2 %1553, %v43_v26  }
  0x30   :  { %837 = vmatpush.bf16.msra.mxu1 %v1521_v56  ;;  %1542 = vmatpush.bf16.msrb.mxu3 %v1521_v56 }
  0x32   :  { %456 = vperm.xlu1 %1552, %v53_v27  }
  0x33   :  { %451 = vperm.xlu0 %1551, %v52_v28  }
  0x35   :  { %411 = vperm.xlu2 %1553, %v44_v29  }
  0x3a   :  { %1426 = vmatmul.msk.bf16.gmra.mxu0 %vm190_vm0, %v1506_v30  ;;  %461 = vperm.xlu1 %1552, %v54_v31  }
  0x3b   :  { %416 = vperm.xlu0 %1551, %v45_v32  }
  0x3d   :  { %466 = vperm.xlu2 %1553, %v55_v33  }
  0x42   :  { %426 = vperm.xlu1 %1552, %v47_v34  }
  0x43   :  { %421 = vperm.xlu0 %1551, %v46_v35  }
  0x45   :  { %471 = vperm.xlu2 %1553, %v56_v36  }
  0x4a   :  { %1427 = vmatmul.msk.bf16.gmra.mxu0 %vm190_vm0, %v1507_v37  ;;  %431 = vperm.xlu1 %1552, %v48_v38   ;;  %v1512_v38 = vld [vmem:[%s2356_s0 + $0x48] sm:$0xff] }
  0x4b   :  { %476 = vperm.xlu0 %1551, %v57_v39  }
  0x4d   :  { %436 = vperm.xlu2 %1553, %v49_v47  }
  0x52   :  { %486 = vperm.xlu1 %1552, %v59_v40  }
  0x53   :  { %481 = vperm.xlu0 %1551, %v58_v41  }
  0x5a   :  { %1428 = vmatmul.msk.bf16.gmra.mxu0 %vm190_vm0, %v1508_v42 }
  0x5f   :  { %v1964_v45 = vpop.permute.xlu2 %351 }
  0x60   :  { %v494_v39 = vsub.f32 %v1964_v45, %v1995_v55 }
  0x62   :  { %v528_v42 = vmul.f32 %v2008_v60, %v494_v39 }
  0x64   :  { %v560_v51 = vmul.f32 %v528_v42, %v494_v39 }
  0x67   :  { %v1978_v50 = vpop.permute.xlu2 %356 }
  0x68   :  { %v495_v41 = vsub.f32 %v1978_v50, %v1995_v55 }
  0x6a   :  { %1429 = vmatmul.msk.bf16.gmra.mxu0 %vm190_vm0, %v1509_v49  ;;  %v529_v47 = vmul.f32 %v2008_v60, %v495_v41 }
  0x6f   :  { %v1987_v53 = vpop.permute.xlu2 %371 }
  0x74   :  { %v2000_v57 = vpop.permute.xlu1 %341  ;;  %v332_v58 = vpop.permute.xlu0 %331 }
  0x75   :  { %v490_v61 = vsub.f32 %v332_v58, %v1995_v55  ;;  %v492_v11 = vsub.f32 %v2000_v57, %v1995_v55  ;;  %v686_v25 = vmul.f32 %v2039_v17, %v332_v58  ;;  %v688_v56 = vmul.f32 %v2039_v17, %v2000_v57  ;;  %v1513_v57 = vld [vmem:[%s2356_s0 + $0x50] sm:$0xff] }
  0x77   :  { %v2011_v62 = vpop.permute.xlu2 %386  ;;  %v524_v63 = vmul.f32 %v2008_v60, %v490_v61  ;;  %v526_v16 = vmul.f32 %v2008_v60, %v492_v11 }
  0x79   :  { %v556_v3 = vmul.f32 %v524_v63, %v490_v61  ;;  %v558_v23 = vmul.f32 %v526_v16, %v492_v11  ;;  %v561_v63 = vmul.f32 %v529_v47, %v495_v41 }
  0x7a   :  { %1430 = vmatmul.msk.bf16.gmra.mxu0 %vm190_vm0, %v1510_v59 }
  0x7b   :  { %v588_v7 = vmul.f32 1.442695, %v556_v3  ;;  %v592_v31 = vmul.f32 1.442695, %v558_v23 }
  0x7c   :  { %v347_v0 = vpop.permute.xlu1 %346 }
  0x7d   :  { %v337_v1 = vpop.permute.xlu0 %336  ;;  %1559 = vpow2.f32 %v588_v7  ;;  %v493_v14 = vsub.f32 %v347_v0, %v1995_v55  ;;  %v689_v58 = vmul.f32 %v2039_v17, %v347_v0 }
  0x7e   :  { %v491_v2 = vsub.f32 %v337_v1, %v1995_v55  ;;  %v687_v26 = vmul.f32 %v2039_v17, %v337_v1 }
  0x7f   :  { %v2017_v5 = vpop.permute.xlu2 %441  ;;  %v527_v21 = vmul.f32 %v2008_v60, %v493_v14 }
  0x80   :  { %v525_v4 = vmul.f32 %v2008_v60, %v491_v2 }
  0x81   :  { %v559_v29 = vmul.f32 %v527_v21, %v493_v14 }
  0x82   :  { %v557_v6 = vmul.f32 %v525_v4, %v491_v2  ;;  %v596_v2 = vmul.f32 1.442695, %v560_v51 }
  0x83   :  { %v1560_v20 = vpop.eup %1559  ;;  %v594_v36 = vmul.f32 1.442695, %v559_v29 }
  0x84   :  { %v2019_v8 = vpop.permute.xlu1 %366  ;;  %v590_v9 = vmul.f32 1.442695, %v557_v6 }
  0x85   :  { %v497_v16 = vsub.f32 %v2019_v8, %v1995_v55 }
  0x86   :  { %1561 = vpow2.f32 %v590_v9  ;;  %v598_v9 = vmul.f32 1.442695, %v561_v63 }
  0x87   :  { %v248_v12 = vpop.f32.mrf.mxu0  ;;  %v2033_v15 = vpop.permute.xlu2 %406  ;;  %1563 = vpow2.f32 %v592_v31  ;;  %v690_v31 = vmul.f32 %v2039_v17, %v1964_v45 }
  0x88   :  { %v249_v18 = vadd.f32 %v2029_v13, %v248_v12  ;;  %1565 = vpow2.f32 %v594_v36 }
  0x89   :  { %1567 = vpow2.f32 %v596_v2 }
  0x8a   :  { %1431 = vmatmul.msk.bf16.gmra.mxu0 %vm190_vm0, %v1511_v10  ;;  %v652_v27 = vmul.f32 %v1560_v20, %v249_v18  ;;  %v2076_v10 = vpop.permute.xlu0 %361  ;;  %1569 = vpow2.f32 %v598_v9 }
  0x8b   :  { %v496_v0 = vsub.f32 %v2076_v10, %v1995_v55 }
  0x8c   :  { %v2042_v19 = vpop.permute.xlu1 %381  ;;  %v1562_v22 = vpop.eup %1561  ;;  %v718_v33 = vadd.f32 %v686_v25, %v652_v27  ;;  %v531_v25 = vmul.f32 %v2008_v60, %v497_v16 }
  0x8d   :  { %v1564_v46 = vpop.eup %1563  ;;  %v530_v20 = vmul.f32 %v2008_v60, %v496_v0 }
  0x8e   :  { %v1566_v49 = vpop.eup %1565  ;;  %v313_v18 = vpop.f32.mrf.mxu3 }
  0x8f   :  { %v250_v24 = vpop.f32.mrf.mxu0  ;;  %v2050_v35 = vpop.permute.xlu2 %411 }
  0x90   :  { %v251_v28 = vadd.f32 %v2029_v13, %v250_v24  ;;  %v1568_v24 = vpop.eup %1567 }
  0x91   :  { %v1570_v27 = vpop.eup %1569 }
  0x92   :  { %v653_v30 = vmul.f32 %v1562_v22, %v251_v28  ;;  %v562_v28 = vmul.f32 %v530_v20, %v496_v0  ;;  %v693_v0 = vmul.f32 %v2039_v17, %v2019_v8  ;;  %v1515_v8 = vld [vmem:[%s2356_s0 + $0x60] sm:$0xff] }
  0x94   :  { %v2048_v32 = vpop.permute.xlu1 %396  ;;  %v719_v34 = vadd.f32 %v687_v26, %v653_v30 }
  0x96   :  { %v750_v37 = vpack.c.bf16 %v719_v34, %v718_v33  ;;  %v691_v33 = vmul.f32 %v2039_v17, %v1978_v50  ;;  %v315_v42 = vpop.f32.mrf.mxu3  ;;  %v1514_v50 = vld [vmem:[%s2356_s0 + $0x58] sm:$0xff] }
  0x97   :  { %v253_v40 = vpop.f32.mrf.mxu0  ;;  %v2065_v48 = vpop.permute.xlu2 %466 }
  0x98   :  { %838 = vmatmul.bf16.vlgmr.msra.gmra.mxu1 %v750_v37  ;;  %v254_v43 = vadd.f32 %v2029_v13, %v253_v40  ;;  %v517_v54 = vsub.f32 %v2065_v48, %v1995_v55  ;;  %v563_v37 = vmul.f32 %v531_v25, %v497_v16  ;;  %v600_v40 = vmul.f32 1.442695, %v562_v28 }
  0x9a   :  { %1432 = vmatmul.msk.bf16.gmra.mxu0 %vm190_vm0, %v1512_v38  ;;  %v654_v59 = vmul.f32 %v1564_v46, %v254_v43  ;;  %v551_v3 = vmul.f32 %v2008_v60, %v517_v54  ;;  %v316_v43 = vadd.f32 %v2029_v13, %v315_v42  ;;  %v602_v51 = vmul.f32 1.442695, %v563_v37 }
  0x9c   :  { %v2062_v44 = vpop.permute.xlu1 %401  ;;  %v720_v6 = vadd.f32 %v688_v56, %v654_v59  ;;  %v583_v14 = vmul.f32 %v551_v3, %v517_v54  ;;  %v314_v56 = vadd.f32 %v2029_v13, %v313_v18  ;;  %v692_v18 = vmul.f32 %v2039_v17, %v2076_v10 }
  0x9d   :  { %v500_v10 = vsub.f32 %v2042_v19, %v1995_v55 }
  0x9e   :  { %v642_v21 = vmul.f32 1.442695, %v583_v14 }
  0x9f   :  { %v255_v52 = vpop.f32.mrf.mxu0 }
  0xa0   :  { %v256_v61 = vadd.f32 %v2029_v13, %v255_v52  ;;  %1571 = vpow2.f32 %v642_v21  ;;  %v498_v52 = vsub.f32 %v1987_v53, %v1995_v55 }
  0xa2   :  { %v655_v1 = vmul.f32 %v1566_v49, %v256_v61  ;;  %v377_v61 = vpop.permute.xlu0 %376  ;;  %v532_v2 = vmul.f32 %v2008_v60, %v498_v52 }
  0xa3   :  { %v499_v3 = vsub.f32 %v377_v61, %v1995_v55 }
  0xa4   :  { %v2074_v4 = vpop.permute.xlu1 %456  ;;  %v721_v7 = vadd.f32 %v689_v58, %v655_v1  ;;  %v713_v58 = vmul.f32 %v2039_v17, %v2065_v48 }
  0xa5   :  { %v533_v14 = vmul.f32 %v2008_v60, %v499_v3 }
  0xa6   :  { %v751_v11 = vpack.c.bf16 %v721_v7, %v720_v6  ;;  %v1572_v49 = vpop.eup %1571 }
  0xa7   :  { %v258_v12 = vpop.f32.mrf.mxu0  ;;  %v679_v59 = vmul.f32 %v1572_v49, %v316_v43  ;;  %v565_v25 = vmul.f32 %v533_v14, %v499_v3 }
  0xa8   :  { %843 = vmatmul.bf16.gmra.mxu1 %v751_v11  ;;  %v259_v22 = vadd.f32 %v2029_v13, %v258_v12  ;;  %v564_v12 = vmul.f32 %v532_v2, %v498_v52 }
  0xa9   :  { %v2110_v9 = vadd.f32 %v713_v58, %v679_v59  ;;  %v503_v59 = vsub.f32 %v2048_v32, %v1995_v55 }
  0xaa   :  { %1433 = vmatmul.msk.bf16.gmra.mxu0 %vm190_vm0, %v1513_v57  ;;  %v656_v34 = vmul.f32 %v1568_v24, %v259_v22  ;;  %v604_v24 = vmul.f32 1.442695, %v564_v12  ;;  %v392_v58 = vpop.permute.xlu0 %391  ;;  %v696_v12 = vmul.f32 %v2039_v17, %v2042_v19 }
  0xab   :  { %v537_v3 = vmul.f32 %v2008_v60, %v503_v59 }
  0xac   :  { %v462_v23 = vpop.permute.xlu1 %461  ;;  %v722_v46 = vadd.f32 %v690_v31, %v656_v34  ;;  %v501_v31 = vsub.f32 %v2011_v62, %v1995_v55 }
  0xad   :  { %v516_v26 = vsub.f32 %v462_v23, %v1995_v55  ;;  %v712_v63 = vmul.f32 %v2039_v17, %v462_v23 }
  0xae   :  { %v535_v37 = vmul.f32 %v2008_v60, %v501_v31 }
  0xaf   :  { %v550_v29 = vmul.f32 %v2008_v60, %v516_v26  ;;  %v260_v30 = vpop.f32.mrf.mxu0 }
  0xb0   :  { %v261_v36 = vadd.f32 %v2029_v13, %v260_v30 }
  0xb1   :  { %v582_v38 = vmul.f32 %v550_v29, %v516_v26  ;;  %v606_v29 = vmul.f32 1.442695, %v565_v25 }
  0xb2   :  { %v657_v39 = vmul.f32 %v1570_v27, %v261_v36 }
  0xb3   :  { %v640_v41 = vmul.f32 1.442695, %v582_v38 }
  0xb4   :  { %v723_v47 = vadd.f32 %v691_v33, %v657_v39  ;;  %v534_v33 = vmul.f32 %v2008_v60, %v500_v10 }
  0xb5   :  { %1573 = vpow2.f32 %v640_v41 }
  0xb6   :  { %v752_v45 = vpack.c.bf16 %v723_v47, %v722_v46  ;;  %1575 = vpow2.f32 %v600_v40  ;;  %v566_v38 = vmul.f32 %v534_v33, %v500_v10  ;;  %v694_v40 = vmul.f32 %v2039_v17, %v1987_v53 }
  0xb7   :  { %v263_v54 = vpop.f32.mrf.mxu0  ;;  %1577 = vpow2.f32 %v602_v51  ;;  %v567_v46 = vmul.f32 %v535_v37, %v501_v31  ;;  %v695_v47 = vmul.f32 %v2039_v17, %v377_v61  ;;  %v502_v53 = vsub.f32 %v392_v58, %v1995_v55 }
  0xb8   :  { %848 = vmatmul.bf16.gmra.mxu1 %v752_v45  ;;  %v264_v6 = vadd.f32 %v2029_v13, %v263_v54  ;;  %1579 = vpow2.f32 %v604_v24  ;;  %v608_v51 = vmul.f32 1.442695, %v566_v38  ;;  %v699_v37 = vmul.f32 %v2039_v17, %v2048_v32 }
  0xb9   :  { %1581 = vpow2.f32 %v606_v29  ;;  %v610_v52 = vmul.f32 1.442695, %v567_v46  ;;  %v536_v61 = vmul.f32 %v2008_v60, %v502_v53  ;;  %v698_v38 = vmul.f32 %v2039_v17, %v392_v58 }
  0xba   :  { %1434 = vmatmul.msk.bf16.gmra.mxu0 %vm190_vm0, %v1514_v50  ;;  %1583 = vpow2.f32 %v608_v51  ;;  %v506_v51 = vsub.f32 %v2050_v35, %v1995_v55 }
  0xbb   :  { %v1574_v1 = vpop.eup %1573  ;;  %1585 = vpow2.f32 %v610_v52 }
  0xbc   :  { %v678_v7 = vmul.f32 %v1574_v1, %v314_v56  ;;  %v1576_v11 = vpop.eup %1575  ;;  %v540_v52 = vmul.f32 %v2008_v60, %v506_v51 }
  0xbd   :  { %v1578_v57 = vpop.eup %1577  ;;  %v658_v20 = vmul.f32 %v1576_v11, %v264_v6 }
  0xbe   :  { %v2112_v48 = vadd.f32 %v712_v63, %v678_v7  ;;  %v1580_v36 = vpop.eup %1579  ;;  %v697_v7 = vmul.f32 %v2039_v17, %v2011_v62  ;;  %v504_v62 = vsub.f32 %v2062_v44, %v1995_v55 }
  0xbf   :  { %v265_v16 = vpop.f32.mrf.mxu0  ;;  %v724_v26 = vadd.f32 %v692_v18, %v658_v20  ;;  %v1582_v43 = vpop.eup %1581 }
  0xc0   :  { %v266_v21 = vadd.f32 %v2029_v13, %v265_v16  ;;  %v763_v22 = vpack.c.bf16 %v2110_v9, %v2112_v48  ;;  %v1584_v1 = vpop.eup %1583  ;;  %v569_v16 = vmul.f32 %v537_v3, %v503_v59 }
  0xc1   :  { %v1586_v2 = vpop.eup %1585 }
  0xc2   :  { %v659_v23 = vmul.f32 %v1578_v57, %v266_v21  ;;  %v614_v25 = vmul.f32 1.442695, %v569_v16 }
  0xc4   :  { %v725_v27 = vadd.f32 %v693_v0, %v659_v23  ;;  %v568_v0 = vmul.f32 %v536_v61, %v502_v53  ;;  %v2148_v23 = vpop.permute.xlu0 %446  ;;  %v700_v61 = vmul.f32 %v2039_v17, %v2062_v44 }
  0xc6   :  { %v753_v28 = vpack.c.bf16 %v725_v27, %v724_v26  ;;  %v612_v21 = vmul.f32 1.442695, %v568_v0  ;;  %v505_v27 = vsub.f32 %v2033_v15, %v1995_v55  ;;  %v1532_v0 = vld [vmem:[%s2361_s5 + $0x18] sm:$0xff] }
  0xc7   :  { %v268_v30 = vpop.f32.mrf.mxu0  ;;  %1216 = vmatpush.bf16.msra.mxu2 %v1532_v0  ;;  %1543 = vmatpush.bf16.msra.mxu3 %v1532_v0 }
  0xc8   :  { %853 = vmatmul.bf16.gmra.mxu1 %v753_v28  ;;  %v269_v34 = vadd.f32 %v2029_v13, %v268_v30  ;;  %1587 = vpow2.f32 %v612_v21  ;;  %v538_v28 = vmul.f32 %v2008_v60, %v504_v62  ;;  %v539_v10 = vmul.f32 %v2008_v60, %v505_v27 }
  0xc9   :  { %1589 = vpow2.f32 %v614_v25 }
  0xca   :  { %1435 = vmatmul.msk.bf16.gmra.mxu0 %vm190_vm0, %v1515_v8  ;;  %v660_v41 = vmul.f32 %v1580_v36, %v269_v34  ;;  %v570_v36 = vmul.f32 %v538_v28, %v504_v62 }
  0xcc   :  { %v726_v45 = vadd.f32 %v694_v40, %v660_v41  ;;  %v2157_v30 = vpop.permute.xlu0 %451  ;;  %v571_v40 = vmul.f32 %v539_v10, %v505_v27 }
  0xce   :  { %v1588_v8 = vpop.eup %1587 }
  0xcf   :  { %v270_v39 = vpop.f32.mrf.mxu0  ;;  %v1590_v34 = vpop.eup %1589 }
  0xd0   :  { %v271_v42 = vadd.f32 %v2029_v13, %v270_v39 }
  0xd2   :  { %v661_v49 = vmul.f32 %v1582_v43, %v271_v42  ;;  %v616_v43 = vmul.f32 1.442695, %v570_v36 }
  0xd4   :  { %v727_v50 = vadd.f32 %v695_v47, %v661_v49  ;;  %v618_v47 = vmul.f32 1.442695, %v571_v40  ;;  %1591 = vpow2.f32 %v616_v43 }
  0xd6   :  { %v754_v54 = vpack.c.bf16 %v727_v50, %v726_v45  ;;  %v417_v45 = vpop.permute.xlu0 %416  ;;  %1593 = vpow2.f32 %v618_v47 }
  0xd7   :  { %v273_v56 = vpop.f32.mrf.mxu0  ;;  %v507_v50 = vsub.f32 %v417_v45, %v1995_v55  ;;  %v703_v36 = vmul.f32 %v2039_v17, %v417_v45 }
  0xd8   :  { %858 = vmatmul.bf16.gmra.mxu1 %v754_v54  ;;  %v274_v63 = vadd.f32 %v2029_v13, %v273_v56 }
  0xd9   :  { %v541_v56 = vmul.f32 %v2008_v60, %v507_v50 }
  0xda   :  { %v662_v11 = vmul.f32 %v1584_v1, %v274_v63  ;;  %v1592_v54 = vpop.eup %1591  ;;  %v572_v1 = vmul.f32 %v540_v52, %v506_v51 }
  0xdc   :  { %v728_v18 = vadd.f32 %v696_v12, %v662_v11  ;;  %v1594_v63 = vpop.eup %1593 }
  0xdf   :  { %v275_v6 = vpop.f32.mrf.mxu0 }
  0xe0   :  { %v276_v57 = vadd.f32 %v2029_v13, %v275_v6  ;;  %v573_v6 = vmul.f32 %v541_v56, %v507_v50 }
  0xe2   :  { %v663_v14 = vmul.f32 %v1586_v2, %v276_v57  ;;  %v701_v2 = vmul.f32 %v2039_v17, %v2033_v15  ;;  %v620_v57 = vmul.f32 1.442695, %v572_v1  ;;  %v1531_v15 = vld [vmem:[%s2361_s5 + $0x10] sm:$0xff] }
  0xe3   :  { %1217 = vmatpush.bf16.msra.mxu2 %v1531_v15  ;;  %1544 = vmatpush.bf16.msra.mxu3 %v1531_v15 }
  0xe4   :  { %v729_v20 = vadd.f32 %v697_v7, %v663_v14  ;;  %v622_v14 = vmul.f32 1.442695, %v573_v6  ;;  %1595 = vpow2.f32 %v620_v57 }
  0xe6   :  { %v755_v24 = vpack.c.bf16 %v729_v20, %v728_v18  ;;  %v422_v18 = vpop.permute.xlu0 %421  ;;  %v427_v20 = vpop.permute.xlu1 %426  ;;  %1597 = vpow2.f32 %v622_v14 }
  0xe7   :  { %v278_v26 = vpop.f32.mrf.mxu0  ;;  %v508_v44 = vsub.f32 %v422_v18, %v1995_v55  ;;  %v509_v21 = vsub.f32 %v427_v20, %v1995_v55  ;;  %v704_v57 = vmul.f32 %v2039_v17, %v422_v18 }
  0xe8   :  { %863 = vmatmul.bf16.gmra.mxu1 %v755_v24  ;;  %v279_v19 = vadd.f32 %v2029_v13, %v278_v26  ;;  %v1530_v26 = vld [vmem:[%s2361_s5 + $0x8] sm:$0xff] }
  0xe9   :  { %v542_v25 = vmul.f32 %v2008_v60, %v508_v44  ;;  %v543_v27 = vmul.f32 %v2008_v60, %v509_v21  ;;  %1218 = vmatpush.bf16.msra.mxu2 %v1530_v26  ;;  %1545 = vmatpush.bf16.msra.mxu3 %v1530_v26 }
  0xea   :  { %v664_v31 = vmul.f32 %v1588_v8, %v279_v19  ;;  %v1596_v62 = vpop.eup %1595  ;;  %v2188_v19 = vpop.permute.xlu2 %471 }
  0xec   :  { %v730_v41 = vadd.f32 %v698_v38, %v664_v31  ;;  %v574_v31 = vmul.f32 %v542_v25, %v508_v44  ;;  %v575_v38 = vmul.f32 %v543_v27, %v509_v21 }
  0xee   :  { %v2199_v43 = vpop.permute.xlu1 %431 }
  0xef   :  { %v280_v29 = vpop.f32.mrf.mxu0  ;;  %v510_v45 = vsub.f32 %v2199_v43, %v1995_v55 }
  0xf0   :  { %v281_v33 = vadd.f32 %v2029_v13, %v280_v29  ;;  %v1598_v29 = vpop.eup %1597 }
  0xf1   :  { %v544_v52 = vmul.f32 %v2008_v60, %v510_v45 }
  0xf2   :  { %v665_v39 = vmul.f32 %v1590_v34, %v281_v33  ;;  %v1529_v33 = vld [vmem:[%s2361_s5] sm:$0xff]  ;;  %v702_v34 = vmul.f32 %v2039_v17, %v2050_v35  ;;  %v2202_v51 = vpop.permute.xlu2 %436 }
  0xf3   :  { %1219 = vmatpush.bf16.msra.mxu2 %v1529_v33  ;;  %1546 = vmatpush.bf16.msra.mxu3 %v1529_v33  ;;  %v576_v1 = vmul.f32 %v544_v52, %v510_v45  ;;  %v706_v45 = vmul.f32 %v2039_v17, %v2199_v43 }
  0xf4   :  { %v731_v42 = vadd.f32 %v699_v37, %v665_v39 }
  0xf5   :  { %v628_v14 = vmul.f32 1.442695, %v576_v1 }
  0xf6   :  { %v756_v46 = vpack.c.bf16 %v731_v42, %v730_v41  ;;  %v624_v41 = vmul.f32 1.442695, %v574_v31 }
  0xf7   :  { %v283_v49 = vpop.f32.mrf.mxu0 }
  0xf8   :  { %868 = vmatmul.bf16.gmra.mxu1 %v756_v46  ;;  %v284_v32 = vadd.f32 %v2029_v13, %v283_v49  ;;  %v626_v49 = vmul.f32 1.442695, %v575_v38  ;;  %1599 = vpow2.f32 %v624_v41 }
  0xfa   :  { %v666_v53 = vmul.f32 %v1592_v54, %v284_v32  ;;  %v511_v32 = vsub.f32 %v2202_v51, %v1995_v55  ;;  %1601 = vpow2.f32 %v626_v49 }
  0xfc   :  { %v732_v7 = vadd.f32 %v700_v61, %v666_v53 }
  0xff   :  { %v285_v58 = vpop.f32.mrf.mxu0 }
 0x100   :  { %v286_v59 = vadd.f32 %v2029_v13, %v285_v58  ;;  %v545_v58 = vmul.f32 %v2008_v60, %v511_v32 }
 0x102   :  { %v667_v3 = vmul.f32 %v1594_v63, %v286_v59  ;;  %v1600_v59 = vpop.eup %1599  ;;  %v577_v0 = vmul.f32 %v545_v58, %v511_v32 }
 0x103   :  { %v1602_v6 = vpop.eup %1601 }
 0x104   :  { %v733_v11 = vadd.f32 %v701_v2, %v667_v3 }
 0x106   :  { %v757_v12 = vpack.c.bf16 %v733_v11, %v732_v7  ;;  %v705_v7 = vmul.f32 %v2039_v17, %v427_v20  ;;  %v512_v20 = vsub.f32 %v2017_v5, %v1995_v55 }
 0x107   :  { %v288_v16 = vpop.f32.mrf.mxu0 }
 0x108   :  { %873 = vmatmul.bf16.gmra.mxu1 %v757_v12  ;;  %v289_v24 = vadd.f32 %v2029_v13, %v288_v16 }
 0x10a   :  { %v668_v8 = vmul.f32 %v1596_v62, %v289_v24  ;;  %v630_v24 = vmul.f32 1.442695, %v577_v0 }
 0x10c   :  { %v734_v39 = vadd.f32 %v702_v34, %v668_v8 }
 0x10f   :  { %v290_v28 = vpop.f32.mrf.mxu0 }
 0x110   :  { %v291_v10 = vadd.f32 %v2029_v13, %v290_v28  ;;  %v513_v28 = vsub.f32 %v2148_v23, %v1995_v55 }
 0x112   :  { %v669_v37 = vmul.f32 %v1598_v29, %v291_v10  ;;  %v546_v10 = vmul.f32 %v2008_v60, %v512_v20  ;;  %v547_v31 = vmul.f32 %v2008_v60, %v513_v28 }
 0x114   :  { %v735_v40 = vadd.f32 %v703_v36, %v669_v37 }
 0x115   :  { %v2197_v42 = vpop.f32.mrf.mxu1 }
 0x116   :  { %v919_v46 = vsub.f32 0.0, %v2197_v42  ;;  %v758_v47 = vpack.c.bf16 %v735_v40, %v734_v39  ;;  %v578_v40 = vmul.f32 %v546_v10, %v512_v20  ;;  %v709_v10 = vmul.f32 %v2039_v17, %v2148_v23 }
 0x117   :  { %v293_v35 = vpop.f32.mrf.mxu0 }
 0x118   :  { %v951_v50 = vmul.f32 1.442695, %v919_v46  ;;  %878 = vmatmul.bf16.gmra.mxu1 %v758_v47  ;;  %v294_v54 = vadd.f32 %v2029_v13, %v293_v35  ;;  %v579_v35 = vmul.f32 %v547_v31, %v513_v28 }
 0x11a   :  { %1603 = vpow2.f32 %v951_v50  ;;  %v670_v61 = vmul.f32 %v1600_v59, %v294_v54  ;;  %v707_v50 = vmul.f32 %v2039_v17, %v2202_v51 }
 0x11c   :  { %v736_v16 = vadd.f32 %v704_v57, %v670_v61 }
 0x11d   :  { %v841_v56 = vpop.f32.mrf.mxu1 }
 0x11e   :  { %v920_v53 = vsub.f32 0.0, %v841_v56 }
 0x11f   :  { %v295_v63 = vpop.f32.mrf.mxu0 }
 0x120   :  { %v953_v2 = vmul.f32 1.442695, %v920_v53  ;;  %v296_v3 = vadd.f32 %v2029_v13, %v295_v63  ;;  %v1604_v11 = vpop.eup %1603  ;;  %v632_v53 = vmul.f32 1.442695, %v578_v40 }
 0x121   :  { %v1015_v15 = vadd.f32 1.0, %v1604_v11  ;;  %v515_v11 = vsub.f32 %v2074_v4, %v1995_v55 }
 0x122   :  { %1605 = vpow2.f32 %v953_v2  ;;  %v671_v12 = vmul.f32 %v1602_v6, %v296_v3  ;;  %v634_v3 = vmul.f32 1.442695, %v579_v35 }
 0x123   :  { %1607 = vpow2.f32 %v628_v14  ;;  %v549_v14 = vmul.f32 %v2008_v60, %v515_v11 }
 0x124   :  { %v737_v44 = vadd.f32 %v705_v7, %v671_v12  ;;  %1609 = vrcp.f32 %v1015_v15 }
 0x125   :  { %v2214_v21 = vpop.f32.mrf.mxu1  ;;  %1611 = vpow2.f32 %v630_v24 }
 0x126   :  { %v921_v25 = vsub.f32 0.0, %v2214_v21  ;;  %v759_v26 = vpack.c.bf16 %v737_v44, %v736_v16 }
 0x127   :  { %v298_v62 = vpop.f32.mrf.mxu0 }
 0x128   :  { %v1606_v27 = vpop.eup %1605  ;;  %v955_v18 = vmul.f32 1.442695, %v921_v25  ;;  %883 = vmatmul.bf16.gmra.mxu1 %v759_v26  ;;  %v299_v29 = vadd.f32 %v2029_v13, %v298_v62 }
 0x129   :  { %v1016_v8 = vadd.f32 1.0, %v1606_v27  ;;  %v1608_v34 = vpop.eup %1607 }
 0x12a   :  { %v1610_v37 = vpop.eup %1609  ;;  %v672_v41 = vmul.f32 %v1608_v34, %v299_v29  ;;  %v581_v29 = vmul.f32 %v549_v14, %v515_v11 }
 0x12b   :  { %1613 = vrcp.f32 %v1016_v8  ;;  %v1612_v39 = vpop.eup %1611  ;;  %v1079_v52 = vmul.f32 %v1610_v37, %v2197_v42  ;;  %v514_v42 = vsub.f32 %v2157_v30, %v1995_v55  ;;  %v708_v8 = vmul.f32 %v2039_v17, %v2017_v5 }
 0x12c   :  { %1615 = vpow2.f32 %v955_v18  ;;  %v738_v63 = vadd.f32 %v706_v45, %v672_v41 }
 0x12d   :  { %v846_v33 = vpop.f32.mrf.mxu1  ;;  %v548_v0 = vmul.f32 %v2008_v60, %v514_v42 }
 0x12e   :  { %v922_v36 = vsub.f32 0.0, %v846_v33 }
 0x12f   :  { %v300_v38 = vpop.f32.mrf.mxu0  ;;  %v580_v62 = vmul.f32 %v548_v0, %v514_v42 }
 0x130   :  { %v957_v46 = vmul.f32 1.442695, %v922_v36  ;;  %v301_v47 = vadd.f32 %v2029_v13, %v300_v38 }
 0x131   :  { %v1614_v49 = vpop.eup %1613  ;;  %v636_v38 = vmul.f32 1.442695, %v580_v62 }
 0x132   :  { %v1616_v32 = vpop.eup %1615  ;;  %v1080_v54 = vmul.f32 %v1614_v49, %v841_v56  ;;  %1617 = vpow2.f32 %v957_v46  ;;  %v673_v58 = vmul.f32 %v1612_v39, %v301_v47  ;;  %v638_v49 = vmul.f32 1.442695, %v581_v29 }
 0x133   :  { %v1017_v61 = vadd.f32 1.0, %v1616_v32  ;;  %1619 = vpow2.f32 %v632_v53 }
 0x134   :  { %v1111_v59 = vpack.c.bf16 %v1080_v54, %v1079_v52  ;;  %v739_v1 = vadd.f32 %v707_v50, %v673_v58 }
 0x135   :  { %v2230_v2 = vpop.f32.mrf.mxu1  ;;  %1621 = vrcp.f32 %v1017_v61 }
 0x136   :  { %v923_v43 = vsub.f32 0.0, %v2230_v2  ;;  %1487 = vmatmul.msk.bf16.vlgmr.msra.gmra.mxu2 %vm1163_vm1, %v1111_v59  ;;  %v760_v51 = vpack.c.bf16 %v739_v1, %v738_v63  ;;  %1623 = vpow2.f32 %v634_v3 }
 0x137   :  { %v303_v6 = vpop.f32.mrf.mxu0 }
 0x138   :  { %v1618_v7 = vpop.eup %1617  ;;  %v959_v56 = vmul.f32 1.442695, %v923_v43  ;;  %888 = vmatmul.bf16.gmra.mxu1 %v760_v51  ;;  %v304_v12 = vadd.f32 %v2029_v13, %v303_v6  ;;  %v711_v43 = vmul.f32 %v2039_v17, %v2074_v4  ;;  %v710_v51 = vmul.f32 %v2039_v17, %v2157_v30 }
 0x139   :  { %v1018_v57 = vadd.f32 1.0, %v1618_v7  ;;  %v1620_v44 = vpop.eup %1619  ;;  %v2257_v7 = vpop.permute.xlu0 %476 }
 0x13a   :  { %v674_v27 = vmul.f32 %v1620_v44, %v304_v12  ;;  %v519_v4 = vsub.f32 %v2257_v7, %v1995_v55 }
 0x13b   :  { %1625 = vrcp.f32 %v1018_v57  ;;  %v1622_v24 = vpop.eup %1621  ;;  %v518_v57 = vsub.f32 %v2188_v19, %v1995_v55 }
 0x13c   :  { %1627 = vpow2.f32 %v959_v56  ;;  %v1624_v26 = vpop.eup %1623  ;;  %v1081_v34 = vmul.f32 %v1622_v24, %v2214_v21  ;;  %v740_v40 = vadd.f32 %v708_v8, %v674_v27  ;;  %v318_v24 = vpop.f32.mrf.mxu3  ;;  %v553_v62 = vmul.f32 %v2008_v60, %v519_v4 }
 0x13d   :  { %v851_v16 = vpop.f32.mrf.mxu1 }
 0x13e   :  { %v924_v15 = vsub.f32 0.0, %v851_v16 }
 0x13f   :  { %v305_v25 = vpop.f32.mrf.mxu0 }
 0x140   :  { %v961_v20 = vmul.f32 1.442695, %v924_v15  ;;  %v306_v18 = vadd.f32 %v2029_v13, %v305_v25  ;;  %v552_v25 = vmul.f32 %v2008_v60, %v518_v57 }
 0x141   :  { %v1626_v28 = vpop.eup %1625 }
 0x142   :  { %v1628_v31 = vpop.eup %1627  ;;  %v1082_v36 = vmul.f32 %v1626_v28, %v846_v33  ;;  %1629 = vpow2.f32 %v961_v20  ;;  %v675_v37 = vmul.f32 %v1624_v26, %v306_v18  ;;  %v584_v20 = vmul.f32 %v552_v25, %v518_v57 }
 0x143   :  { %v1019_v46 = vadd.f32 1.0, %v1628_v31  ;;  %1631 = vpow2.f32 %v636_v38  ;;  %v585_v18 = vmul.f32 %v553_v62, %v519_v4 }
 0x144   :  { %v1112_v39 = vpack.c.bf16 %v1082_v36, %v1081_v34  ;;  %v741_v41 = vadd.f32 %v709_v10, %v675_v37  ;;  %v644_v29 = vmul.f32 1.442695, %v584_v20  ;;  %v2270_v37 = vpop.permute.xlu1 %486 }
 0x145   :  { %v2247_v47 = vpop.f32.mrf.mxu1  ;;  %1633 = vrcp.f32 %v1019_v46  ;;  %v646_v36 = vmul.f32 1.442695, %v585_v18 }
 0x146   :  { %v925_v5 = vsub.f32 0.0, %v2247_v47  ;;  %1488 = vmatmul.msk.bf16.gmra.mxu2 %vm1163_vm1, %v1112_v39  ;;  %v761_v23 = vpack.c.bf16 %v741_v41, %v740_v40  ;;  %1635 = vpow2.f32 %v638_v49  ;;  %v320_v39 = vpop.f32.mrf.mxu3  ;;  %v2272_v40 = vpop.permute.xlu0 %481  ;;  %v521_v49 = vsub.f32 %v2270_v37, %v1995_v55 }
 0x147   :  { %v308_v35 = vpop.f32.mrf.mxu0 }
 0x148   :  { %v1630_v45 = vpop.eup %1629  ;;  %v963_v21 = vmul.f32 1.442695, %v925_v5  ;;  %893 = vmatmul.bf16.vlgmr.msrb.gmra.mxu3 %v761_v23  ;;  %v309_v50 = vadd.f32 %v2029_v13, %v308_v35  ;;  %v520_v23 = vsub.f32 %v2272_v40, %v1995_v55 }
 0x149   :  { %v1020_v33 = vadd.f32 1.0, %v1630_v45  ;;  %v1632_v52 = vpop.eup %1631 }
 0x14a   :  { %v676_v63 = vmul.f32 %v1632_v52, %v309_v50  ;;  %v554_v52 = vmul.f32 %v2008_v60, %v520_v23 }
 0x14b   :  { %1637 = vrcp.f32 %v1020_v33  ;;  %v1634_v58 = vpop.eup %1633 }
 0x14c   :  { %1639 = vpow2.f32 %v963_v21  ;;  %v1636_v59 = vpop.eup %1635  ;;  %v1083_v42 = vmul.f32 %v1634_v58, %v2230_v2  ;;  %v742_v12 = vadd.f32 %v710_v51, %v676_v63  ;;  %v321_v58 = vadd.f32 %v2029_v13, %v320_v39 }
 0x14d   :  { %v856_v32 = vpop.f32.mrf.mxu1 }
 0x14e   :  { %v926_v54 = vsub.f32 0.0, %v856_v32  ;;  %v323_v63 = vpop.f32.mrf.mxu3 }
 0x14f   :  { %v310_v53 = vpop.f32.mrf.mxu0 }
 0x150   :  { %v965_v1 = vmul.f32 1.442695, %v926_v54  ;;  %v311_v61 = vadd.f32 %v2029_v13, %v310_v53 }
 0x151   :  { %v1638_v3 = vpop.eup %1637 }
 0x152   :  { %v1640_v6 = vpop.eup %1639  ;;  %v1084_v56 = vmul.f32 %v1638_v3, %v851_v16  ;;  %1641 = vpow2.f32 %v965_v1  ;;  %v677_v11 = vmul.f32 %v1636_v59, %v311_v61  ;;  %v714_v1 = vmul.f32 %v2039_v17, %v2188_v19 }
 0x153   :  { %v1021_v44 = vadd.f32 1.0, %v1640_v6  ;;  %v586_v61 = vmul.f32 %v554_v52, %v520_v23 }
 0x154   :  { %v1113_v0 = vpack.c.bf16 %v1084_v56, %v1083_v42  ;;  %v743_v14 = vadd.f32 %v711_v43, %v677_v11 }
 0x155   :  { %v2264_v15 = vpop.f32.mrf.mxu1  ;;  %1643 = vrcp.f32 %v1021_v44  ;;  %v648_v42 = vmul.f32 1.442695, %v586_v61 }
 0x156   :  { %v927_v30 = vsub.f32 0.0, %v2264_v15  ;;  %1489 = vmatmul.msk.bf16.gmra.mxu2 %vm1163_vm1, %v1113_v0  ;;  %v762_v2 = vpack.c.bf16 %v743_v14, %v742_v12  ;;  %v325_v44 = vpop.f32.mrf.mxu3 }
 0x158   :  { %v1642_v16 = vpop.eup %1641  ;;  %v967_v26 = vmul.f32 1.442695, %v927_v30  ;;  %898 = vmatmul.bf16.gmra.mxu3 %v762_v2 }
 0x159   :  { %v1022_v27 = vadd.f32 1.0, %v1642_v16 }
 0x15b   :  { %1645 = vrcp.f32 %v1022_v27  ;;  %v1644_v10 = vpop.eup %1643 }
 0x15c   :  { %1647 = vpow2.f32 %v967_v26  ;;  %v1085_v41 = vmul.f32 %v1644_v10, %v2247_v47  ;;  %v555_v47 = vmul.f32 %v2008_v60, %v521_v49  ;;  %v715_v60 = vmul.f32 %v2039_v17, %v2257_v7  ;;  %v1752_v10 = vld [vmem:[%s2359_s3 + $0x3] ss:$0 sm:$0xff] }
 0x15d   :  { %v861_v28 = vpop.f32.mrf.mxu1 }
 0x15e   :  { %v928_v8 = vsub.f32 0.0, %v861_v28  ;;  %v587_v59 = vmul.f32 %v555_v47, %v521_v49 }
 0x160   :  { %v969_v31 = vmul.f32 1.442695, %v928_v8  ;;  %v650_v51 = vmul.f32 1.442695, %v587_v59 }
 0x161   :  { %v1646_v34 = vpop.eup %1645 }
 0x162   :  { %v1648_v38 = vpop.eup %1647  ;;  %v1086_v46 = vmul.f32 %v1646_v34, %v856_v32  ;;  %1649 = vpow2.f32 %v969_v31  ;;  %v319_v32 = vadd.f32 %v2029_v13, %v318_v24  ;;  %v716_v31 = vmul.f32 %v1752_v10, %v2272_v40 }
 0x163   :  { %1651 = vpow2.f32 %v644_v29  ;;  %v1023_v35 = vadd.f32 1.0, %v1648_v38  ;;  %v717_v29 = vmul.f32 %v1752_v10, %v2270_v37 }
 0x164   :  { %v1114_v5 = vpack.c.bf16 %v1086_v46, %v1085_v41  ;;  %1653 = vpow2.f32 %v646_v36 }
 0x165   :  { %v2279_v45 = vpop.f32.mrf.mxu1  ;;  %1655 = vrcp.f32 %v1023_v35 }
 0x166   :  { %v929_v21 = vsub.f32 0.0, %v2279_v45  ;;  %1490 = vmatmul.msk.bf16.gmra.mxu2 %vm1163_vm1, %v1114_v5 }
 0x168   :  { %v1650_v33 = vpop.eup %1649  ;;  %v971_v50 = vmul.f32 1.442695, %v929_v21  ;;  %903 = vmatmul.bf16.gmra.mxu3 %v763_v22 }
 0x169   :  { %v1024_v55 = vadd.f32 1.0, %v1650_v33  ;;  %v1652_v54 = vpop.eup %1651 }
 0x16a   :  { %v1654_v53 = vpop.eup %1653  ;;  %v680_v48 = vmul.f32 %v1652_v54, %v319_v32 }
 0x16b   :  { %1657 = vrcp.f32 %v1024_v55  ;;  %v681_v22 = vmul.f32 %v1654_v53, %v321_v58  ;;  %v1656_v43 = vpop.eup %1655 }
 0x16c   :  { %1659 = vpow2.f32 %v971_v50  ;;  %v746_v56 = vadd.f32 %v714_v1, %v680_v48  ;;  %v1087_v57 = vmul.f32 %v1656_v43, %v2264_v15  ;;  %v1751_v15 = vld [vmem:[%s2359_s3] ss:$0 sm:$0xff] }
 0x16d   :  { %v866_v9 = vpop.f32.mrf.mxu1  ;;  %v747_v19 = vadd.f32 %v715_v60, %v681_v22  ;;  %v326_v16 = vadd.f32 %v1751_v15, %v325_v44  ;;  %v324_v26 = vadd.f32 %v1751_v15, %v323_v63 }
 0x16e   :  { %v930_v3 = vsub.f32 0.0, %v866_v9 }
 0x16f   :  { %v764_v17 = vpack.c.bf16 %v747_v19, %v746_v56 }
 0x170   :  { %v973_v6 = vmul.f32 1.442695, %v930_v3 }
 0x171   :  { %v1658_v13 = vpop.eup %1657 }
 0x172   :  { %v1660_v11 = vpop.eup %1659  ;;  %v1088_v0 = vmul.f32 %v1658_v13, %v861_v28  ;;  %1661 = vpow2.f32 %v973_v6 }
 0x173   :  { %1663 = vpow2.f32 %v650_v51  ;;  %v1025_v14 = vadd.f32 1.0, %v1660_v11 }
 0x174   :  { %v1115_v12 = vpack.c.bf16 %v1088_v0, %v1087_v57  ;;  %1665 = vpow2.f32 %v648_v42 }
 0x175   :  { %v869_v4 = vpop.f32.mrf.mxu1  ;;  %1667 = vrcp.f32 %v1025_v14 }
 0x176   :  { %v931_v30 = vsub.f32 0.0, %v869_v4  ;;  %1491 = vmatmul.msk.bf16.gmra.mxu2 %vm1163_vm1, %v1115_v12 }
 0x178   :  { %v1662_v7 = vpop.eup %1661  ;;  %v975_v2 = vmul.f32 1.442695, %v931_v30  ;;  %908 = vmatmul.bf16.gmra.mxu3 %v764_v17 }
 0x179   :  { %v1026_v24 = vadd.f32 1.0, %v1662_v7  ;;  %v1664_v25 = vpop.eup %1663 }
 0x17a   :  { %v1666_v62 = vpop.eup %1665  ;;  %v683_v27 = vmul.f32 %v1664_v25, %v326_v16 }
 0x17b   :  { %1669 = vrcp.f32 %v1026_v24  ;;  %v682_v18 = vmul.f32 %v1666_v62, %v324_v26  ;;  %v1668_v8 = vpop.eup %1667 }
 0x17c   :  { %1671 = vpow2.f32 %v975_v2  ;;  %v749_v38 = vadd.f32 %v717_v29, %v683_v27  ;;  %v1089_v41 = vmul.f32 %v1668_v8, %v2279_v45 }
 0x17d   :  { %v871_v20 = vpop.f32.mrf.mxu1  ;;  %v748_v49 = vadd.f32 %v716_v31, %v682_v18 }
 0x17e   :  { %v932_v28 = vsub.f32 0.0, %v871_v20 }
 0x17f   :  { %v765_v33 = vpack.c.bf16 %v749_v38, %v748_v49 }
 0x180   :  { %v977_v34 = vmul.f32 1.442695, %v932_v28 }
 0x181   :  { %v1670_v36 = vpop.eup %1669 }
 0x182   :  { %v1672_v39 = vpop.eup %1671  ;;  %v1090_v46 = vmul.f32 %v1670_v36, %v866_v9  ;;  %1673 = vpow2.f32 %v977_v34 }
 0x183   :  { %v1027_v23 = vadd.f32 1.0, %v1672_v39 }
 0x184   :  { %v1116_v5 = vpack.c.bf16 %v1090_v46, %v1089_v41 }
 0x185   :  { %v874_v35 = vpop.f32.mrf.mxu1  ;;  %1675 = vrcp.f32 %v1027_v23 }
 0x186   :  { %v933_v21 = vsub.f32 0.0, %v874_v35  ;;  %1492 = vmatmul.msk.bf16.gmra.mxu2 %vm1163_vm1, %v1116_v5 }
 0x188   :  { %v1674_v47 = vpop.eup %1673  ;;  %v979_v37 = vmul.f32 1.442695, %v933_v21  ;;  %913 = vmatmul.bf16.gmra.mxu3 %v765_v33 }
 0x189   :  { %v1028_v40 = vadd.f32 1.0, %v1674_v47 }
 0x18b   :  { %1677 = vrcp.f32 %v1028_v40  ;;  %v1676_v45 = vpop.eup %1675 }
 0x18c   :  { %1679 = vpow2.f32 %v979_v37  ;;  %v1091_v58 = vmul.f32 %v1676_v45, %v869_v4 }
 0x18d   :  { %v876_v50 = vpop.f32.mrf.mxu1 }
 0x18e   :  { %v934_v32 = vsub.f32 0.0, %v876_v50 }
 0x190   :  { %v981_v52 = vmul.f32 1.442695, %v934_v32 }
 0x191   :  { %v1678_v55 = vpop.eup %1677 }
 0x192   :  { %v1680_v54 = vpop.eup %1679  ;;  %v1092_v53 = vmul.f32 %v1678_v55, %v871_v20  ;;  %1681 = vpow2.f32 %v981_v52  ;;  %v2312_v20 = vld [vmem:[%s2362_s6] ss:$0 sm:$0xff]  ;;  %s1780_s6 = smov [#allocation2]  }
 0x193   :  { %v1029_v63 = vadd.f32 1.0, %v1680_v54  ;;  %s1337_s13 = sshll.u32 %s1780_s6, 4  ;;  %s1338_s13 = int_to_ptr.vmem [resolvable:$true] %s1337_s13 }
 0x194   :  { %v1117_v59 = vpack.c.bf16 %v1092_v53, %v1091_v58 }
 0x195   :  { %v879_v1 = vpop.f32.mrf.mxu1  ;;  %1683 = vrcp.f32 %v1029_v63 }
 0x196   :  { %v935_v61 = vsub.f32 0.0, %v879_v1  ;;  %1493 = vmatmul.msk.bf16.gmra.mxu2 %vm1163_vm1, %v1117_v59 }
 0x198   :  { %v1682_v9 = vpop.eup %1681  ;;  %v983_v48 = vmul.f32 1.442695, %v935_v61 }
 0x199   :  { %v1030_v22 = vadd.f32 1.0, %v1682_v9 }
 0x19b   :  { %1685 = vrcp.f32 %v1030_v22  ;;  %v1684_v60 = vpop.eup %1683 }
 0x19c   :  { %1687 = vpow2.f32 %v983_v48  ;;  %v1093_v42 = vmul.f32 %v1684_v60, %v874_v35 }
 0x19d   :  { %v881_v3 = vpop.f32.mrf.mxu1 }
 0x19e   :  { %v936_v43 = vsub.f32 0.0, %v881_v3 }
 0x1a0   :  { %v985_v51 = vmul.f32 1.442695, %v936_v43 }
 0x1a1   :  { %v1686_v6 = vpop.eup %1685 }
 0x1a2   :  { %v1688_v13 = vpop.eup %1687  ;;  %v1094_v56 = vmul.f32 %v1686_v6, %v876_v50  ;;  %1689 = vpow2.f32 %v985_v51 }
 0x1a3   :  { %v1031_v57 = vadd.f32 1.0, %v1688_v13 }
 0x1a4   :  { %v1118_v11 = vpack.c.bf16 %v1094_v56, %v1093_v42 }
 0x1a5   :  { %v884_v0 = vpop.f32.mrf.mxu1  ;;  %1691 = vrcp.f32 %v1031_v57 }
 0x1a6   :  { %v937_v19 = vsub.f32 0.0, %v884_v0  ;;  %1494 = vmatmul.msk.bf16.gmra.mxu2 %vm1163_vm1, %v1118_v11 }
 0x1a8   :  { %v1690_v12 = vpop.eup %1689  ;;  %v987_v14 = vmul.f32 1.442695, %v937_v19 }
 0x1a9   :  { %v1032_v4 = vadd.f32 1.0, %v1690_v12 }
 0x1ab   :  { %1693 = vrcp.f32 %v1032_v4  ;;  %v1692_v17 = vpop.eup %1691 }
 0x1ac   :  { %1695 = vpow2.f32 %v987_v14  ;;  %v1095_v16 = vmul.f32 %v1692_v17, %v879_v1 }
 0x1ad   :  { %v886_v44 = vpop.f32.mrf.mxu1 }
 0x1ae   :  { %v938_v30 = vsub.f32 0.0, %v886_v44 }
 0x1b0   :  { %v989_v7 = vmul.f32 1.442695, %v938_v30 }
 0x1b1   :  { %v1694_v2 = vpop.eup %1693 }
 0x1b2   :  { %v1696_v15 = vpop.eup %1695  ;;  %v1096_v24 = vmul.f32 %v1694_v2, %v881_v3  ;;  %1697 = vpow2.f32 %v989_v7 }
 0x1b3   :  { %v1033_v26 = vadd.f32 1.0, %v1696_v15 }
 0x1b4   :  { %v1119_v25 = vpack.c.bf16 %v1096_v24, %v1095_v16 }
 0x1b5   :  { %v889_v62 = vpop.f32.mrf.mxu1  ;;  %1699 = vrcp.f32 %v1033_v26 }
 0x1b6   :  { %v939_v27 = vsub.f32 0.0, %v889_v62  ;;  %1495 = vmatmul.msk.bf16.gmra.mxu2 %vm1163_vm1, %v1119_v25 }
 0x1b8   :  { %v1698_v18 = vpop.eup %1697  ;;  %v991_v28 = vmul.f32 1.442695, %v939_v27 }
 0x1b9   :  { %v1034_v8 = vadd.f32 1.0, %v1698_v18  ;;  %v1221_v10 = vpop.f32.mrf.mxu2 }
 0x1ba   :  { %v1222_v29 = vadd.f32 %v2312_v20, %v1221_v10 }
 0x1bb   :  { %1701 = vrcp.f32 %v1034_v8  ;;  %v1700_v36 = vpop.eup %1699 }
 0x1bc   :  { %1703 = vpow2.f32 %v991_v28  ;;  %1301 = vst [vmem:[#allocation2] sm:$0xff] %v1222_v29  ;;  %v1097_v49 = vmul.f32 %v1700_v36, %v884_v0 }
 0x1bd   :  { %v891_v31 = vpop.f32.mrf.mxu1 }
 0x1be   :  { %v940_v34 = vsub.f32 0.0, %v891_v31 }
 0x1c0   :  { %v993_v38 = vmul.f32 1.442695, %v940_v34 }
 0x1c1   :  { %v1702_v39 = vpop.eup %1701  ;;  %v1223_v41 = vpop.f32.mrf.mxu2 }
 0x1c2   :  { %v1704_v46 = vpop.eup %1703  ;;  %v1098_v5 = vmul.f32 %v1702_v39, %v886_v44  ;;  %1705 = vpow2.f32 %v993_v38  ;;  %v1224_v23 = vadd.f32 %v2312_v20, %v1223_v41 }
 0x1c3   :  { %v1035_v21 = vadd.f32 1.0, %v1704_v46 }
 0x1c4   :  { %v1120_v35 = vpack.c.bf16 %v1098_v5, %v1097_v49  ;;  %1302 = vst [vmem:[#allocation2 + $0x8] sm:$0xff] %v1224_v23 }
 0x1c5   :  { %1707 = vrcp.f32 %v1035_v21 }
 0x1c6   :  { %1496 = vmatmul.msk.bf16.gmra.mxu2 %vm1163_vm1, %v1120_v35 }
 0x1c8   :  { %v1706_v33 = vpop.eup %1705 }
 0x1c9   :  { %v1036_v47 = vadd.f32 1.0, %v1706_v33  ;;  %v1226_v37 = vpop.f32.mrf.mxu2 }
 0x1ca   :  { %v1227_v40 = vadd.f32 %v2312_v20, %v1226_v37 }
 0x1cb   :  { %1709 = vrcp.f32 %v1036_v47  ;;  %v894_v50 = vpop.f32.mrf.mxu3  ;;  %v1708_v52 = vpop.eup %1707 }
 0x1cc   :  { %1303 = vst [vmem:[#allocation2 + $0x10] sm:$0xff] %v1227_v40  ;;  %v941_v32 = vsub.f32 0.0, %v894_v50  ;;  %v1099_v58 = vmul.f32 %v1708_v52, %v889_v62 }
 0x1ce   :  { %v995_v45 = vmul.f32 1.442695, %v941_v32 }
 0x1d0   :  { %1711 = vpow2.f32 %v995_v45 }
 0x1d1   :  { %v1710_v55 = vpop.eup %1709  ;;  %v1228_v54 = vpop.f32.mrf.mxu2 }
 0x1d2   :  { %v1100_v53 = vmul.f32 %v1710_v55, %v891_v31  ;;  %v1229_v59 = vadd.f32 %v2312_v20, %v1228_v54 }
 0x1d3   :  { %v896_v63 = vpop.f32.mrf.mxu3 }
 0x1d4   :  { %v1121_v1 = vpack.c.bf16 %v1100_v53, %v1099_v58  ;;  %1304 = vst [vmem:[#allocation2 + $0x18] sm:$0xff] %v1229_v59  ;;  %v942_v61 = vsub.f32 0.0, %v896_v63 }
 0x1d6   :  { %v997_v9 = vmul.f32 1.442695, %v942_v61  ;;  %1497 = vmatmul.msk.bf16.gmra.mxu2 %vm1163_vm1, %v1121_v1  ;;  %v1712_v48 = vpop.eup %1711 }
 0x1d7   :  { %v1037_v43 = vadd.f32 1.0, %v1712_v48 }
 0x1d8   :  { %1713 = vpow2.f32 %v997_v9 }
 0x1d9   :  { %v1231_v22 = vpop.f32.mrf.mxu2  ;;  %1715 = vrcp.f32 %v1037_v43 }
 0x1da   :  { %v1232_v3 = vadd.f32 %v2312_v20, %v1231_v22 }
 0x1db   :  { %v899_v60 = vpop.f32.mrf.mxu3 }
 0x1dc   :  { %1305 = vst [vmem:[#allocation2 + $0x20] sm:$0xff] %v1232_v3  ;;  %v943_v51 = vsub.f32 0.0, %v899_v60 }
 0x1de   :  { %v1714_v6 = vpop.eup %1713  ;;  %v999_v13 = vmul.f32 1.442695, %v943_v51 }
 0x1df   :  { %v1038_v42 = vadd.f32 1.0, %v1714_v6  ;;  %v1716_v19 = vpop.eup %1715 }
 0x1e0   :  { %v1101_v44 = vmul.f32 %v1716_v19, %v894_v50 }
 0x1e1   :  { %1717 = vrcp.f32 %v1038_v42  ;;  %v1233_v56 = vpop.f32.mrf.mxu2 }
 0x1e2   :  { %1719 = vpow2.f32 %v999_v13  ;;  %v1234_v11 = vadd.f32 %v2312_v20, %v1233_v56 }
 0x1e3   :  { %v901_v57 = vpop.f32.mrf.mxu3 }
 0x1e4   :  { %1306 = vst [vmem:[#allocation2 + $0x28] sm:$0xff] %v1234_v11  ;;  %v944_v0 = vsub.f32 0.0, %v901_v57 }
 0x1e6   :  { %v1001_v12 = vmul.f32 1.442695, %v944_v0 }
 0x1e7   :  { %v1718_v14 = vpop.eup %1717 }
 0x1e8   :  { %v1720_v4 = vpop.eup %1719  ;;  %v1102_v30 = vmul.f32 %v1718_v14, %v896_v63  ;;  %1721 = vpow2.f32 %v1001_v12 }
 0x1e9   :  { %v1236_v17 = vpop.f32.mrf.mxu2  ;;  %v1039_v15 = vadd.f32 1.0, %v1720_v4 }
 0x1ea   :  { %v1122_v7 = vpack.c.bf16 %v1102_v30, %v1101_v44  ;;  %v1237_v2 = vadd.f32 %v2312_v20, %v1236_v17 }
 0x1eb   :  { %v904_v16 = vpop.f32.mrf.mxu3  ;;  %1723 = vrcp.f32 %v1039_v15 }
 0x1ec   :  { %1307 = vst [vmem:[#allocation2 + $0x30] sm:$0xff] %v1237_v2  ;;  %v945_v24 = vsub.f32 0.0, %v904_v16  ;;  %1498 = vmatmul.msk.bf16.gmra.mxu2 %vm1163_vm1, %v1122_v7 }
 0x1ee   :  { %v1722_v25 = vpop.eup %1721  ;;  %v1003_v26 = vmul.f32 1.442695, %v945_v24 }
 0x1ef   :  { %v1040_v62 = vadd.f32 1.0, %v1722_v25 }
 0x1f1   :  { %1725 = vrcp.f32 %v1040_v62  ;;  %v1238_v27 = vpop.f32.mrf.mxu2  ;;  %v1724_v10 = vpop.eup %1723 }
 0x1f2   :  { %1727 = vpow2.f32 %v1003_v26  ;;  %v1239_v18 = vadd.f32 %v2312_v20, %v1238_v27  ;;  %v1103_v36 = vmul.f32 %v1724_v10, %v899_v60 }
 0x1f3   :  { %v906_v28 = vpop.f32.mrf.mxu3 }
 0x1f4   :  { %1308 = vst [vmem:[#allocation2 + $0x38] sm:$0xff] %v1239_v18  ;;  %v946_v8 = vsub.f32 0.0, %v906_v28 }
 0x1f6   :  { %v1005_v29 = vmul.f32 1.442695, %v946_v8 }
 0x1f7   :  { %v1726_v31 = vpop.eup %1725 }
 0x1f8   :  { %v1728_v34 = vpop.eup %1727  ;;  %v1104_v38 = vmul.f32 %v1726_v31, %v901_v57  ;;  %1729 = vpow2.f32 %v1005_v29 }
 0x1f9   :  { %v1241_v39 = vpop.f32.mrf.mxu2  ;;  %v1041_v49 = vadd.f32 1.0, %v1728_v34 }
 0x1fa   :  { %v1123_v41 = vpack.c.bf16 %v1104_v38, %v1103_v36  ;;  %v1242_v46 = vadd.f32 %v2312_v20, %v1241_v39 }
 0x1fb   :  { %v909_v5 = vpop.f32.mrf.mxu3  ;;  %1731 = vrcp.f32 %v1041_v49 }
 0x1fc   :  { %1309 = vst [vmem:[#allocation2 + $0x40] sm:$0xff] %v1242_v46  ;;  %v947_v23 = vsub.f32 0.0, %v909_v5  ;;  %1499 = vmatmul.msk.bf16.vlgmr.msra.gmra.mxu3 %vm1163_vm1, %v1123_v41 }
 0x1fe   :  { %v1730_v35 = vpop.eup %1729  ;;  %v1007_v21 = vmul.f32 1.442695, %v947_v23 }
 0x1ff   :  { %v1042_v33 = vadd.f32 1.0, %v1730_v35 }
 0x201   :  { %1733 = vrcp.f32 %v1042_v33  ;;  %v1243_v47 = vpop.f32.mrf.mxu2  ;;  %v1732_v32 = vpop.eup %1731 }
 0x202   :  { %1735 = vpow2.f32 %v1007_v21  ;;  %v1244_v37 = vadd.f32 %v2312_v20, %v1243_v47  ;;  %v1105_v54 = vmul.f32 %v1732_v32, %v904_v16 }
 0x203   :  { %v911_v40 = vpop.f32.mrf.mxu3 }
 0x204   :  { %1310 = vst [vmem:[#allocation2 + $0x48] sm:$0xff] %v1244_v37  ;;  %v948_v50 = vsub.f32 0.0, %v911_v40 }
 0x206   :  { %v1009_v45 = vmul.f32 1.442695, %v948_v50 }
 0x207   :  { %v1734_v52 = vpop.eup %1733 }
 0x208   :  { %v1736_v55 = vpop.eup %1735  ;;  %v1106_v58 = vmul.f32 %v1734_v52, %v906_v28  ;;  %1737 = vpow2.f32 %v1009_v45 }
 0x209   :  { %v1246_v53 = vpop.f32.mrf.mxu2  ;;  %v1043_v1 = vadd.f32 1.0, %v1736_v55 }
 0x20a   :  { %v1124_v59 = vpack.c.bf16 %v1106_v58, %v1105_v54  ;;  %v1247_v63 = vadd.f32 %v2312_v20, %v1246_v53 }
 0x20b   :  { %v914_v61 = vpop.f32.mrf.mxu3  ;;  %1739 = vrcp.f32 %v1043_v1 }
 0x20c   :  { %1311 = vst [vmem:[#allocation2 + $0x50] sm:$0xff] %v1247_v63  ;;  %v949_v9 = vsub.f32 0.0, %v914_v61  ;;  %1500 = vmatmul.msk.bf16.gmra.mxu3 %vm1163_vm1, %v1124_v59 }
 0x20e   :  { %v1738_v48 = vpop.eup %1737  ;;  %v1011_v22 = vmul.f32 1.442695, %v949_v9 }
 0x20f   :  { %v1044_v3 = vadd.f32 1.0, %v1738_v48 }
 0x211   :  { %1741 = vrcp.f32 %v1044_v3  ;;  %v1248_v43 = vpop.f32.mrf.mxu2  ;;  %v1740_v13 = vpop.eup %1739 }
 0x212   :  { %1743 = vpow2.f32 %v1011_v22  ;;  %v1249_v60 = vadd.f32 %v2312_v20, %v1248_v43  ;;  %v1107_v57 = vmul.f32 %v1740_v13, %v909_v5 }
 0x213   :  { %v916_v51 = vpop.f32.mrf.mxu3 }
 0x214   :  { %1312 = vst [vmem:[#allocation2 + $0x58] sm:$0xff] %v1249_v60  ;;  %v950_v6 = vsub.f32 0.0, %v916_v51 }
 0x216   :  { %v1013_v42 = vmul.f32 1.442695, %v950_v6 }
 0x217   :  { %v1742_v56 = vpop.eup %1741 }
 0x218   :  { %v1744_v11 = vpop.eup %1743  ;;  %v1108_v0 = vmul.f32 %v1742_v56, %v911_v40  ;;  %1745 = vpow2.f32 %v1013_v42 }
 0x219   :  { %v1251_v19 = vpop.f32.mrf.mxu2  ;;  %v1045_v4 = vadd.f32 1.0, %v1744_v11 }
 0x21a   :  { %v1125_v12 = vpack.c.bf16 %v1108_v0, %v1107_v57  ;;  %v1252_v14 = vadd.f32 %v2312_v20, %v1251_v19 }
 0x21b   :  { %1747 = vrcp.f32 %v1045_v4 }
 0x21c   :  { %1313 = vst [vmem:[#allocation2 + $0x60] sm:$0xff] %v1252_v14  ;;  %1501 = vmatmul.msk.bf16.gmra.mxu3 %vm1163_vm1, %v1125_v12 }
 0x21e   :  { %v1746_v44 = vpop.eup %1745 }
 0x21f   :  { %v1046_v30 = vadd.f32 1.0, %v1746_v44 }
 0x221   :  { %1749 = vrcp.f32 %v1046_v30  ;;  %v1253_v17 = vpop.f32.mrf.mxu2  ;;  %v1748_v2 = vpop.eup %1747 }
 0x222   :  { %v1254_v7 = vadd.f32 %v2312_v20, %v1253_v17  ;;  %v1109_v16 = vmul.f32 %v1748_v2, %v914_v61 }
 0x224   :  { %1314 = vst [vmem:[#allocation2 + $0x68] sm:$0xff] %v1254_v7 }
 0x227   :  { %v1750_v15 = vpop.eup %1749 }
 0x228   :  { %v1110_v24 = vmul.f32 %v1750_v15, %v916_v51 }
 0x229   :  { %v1256_v25 = vpop.f32.mrf.mxu2 }
 0x22a   :  { %v1126_v26 = vpack.c.bf16 %v1110_v24, %v1109_v16  ;;  %v1257_v62 = vadd.f32 %v2312_v20, %v1256_v25 }
 0x22c   :  { %1315 = vst [vmem:[#allocation2 + $0x70] sm:$0xff] %v1257_v62  ;;  %1502 = vmatmul.msk.bf16.gmra.mxu3 %vm1163_vm1, %v1126_v26 }
 0x231   :  { %v1258_v27 = vpop.f32.mrf.mxu2 }
 0x232   :  { %v1259_v18 = vadd.f32 %v2312_v20, %v1258_v27 }
 0x234   :  { %1316 = vst [vmem:[#allocation2 + $0x78] sm:$0xff] %v1259_v18 }
 0x239   :  { %v1261_v28 = vpop.f32.mrf.mxu2 }
 0x23a   :  { %v1262_v8 = vadd.f32 %v2312_v20, %v1261_v28 }
 0x23c   :  { %1317 = vst [vmem:[#allocation2 + $0x80] sm:$0xff] %v1262_v8 }
 0x241   :  { %v1263_v10 = vpop.f32.mrf.mxu2 }
 0x242   :  { %v1264_v29 = vadd.f32 %v2312_v20, %v1263_v10 }
 0x244   :  { %1318 = vst [vmem:[#allocation2 + $0x88] sm:$0xff] %v1264_v29 }
 0x249   :  { %v1266_v31 = vpop.f32.mrf.mxu2 }
 0x24a   :  { %v1267_v34 = vadd.f32 %v2312_v20, %v1266_v31 }
 0x24c   :  { %1319 = vst [vmem:[#allocation2 + $0x90] sm:$0xff] %v1267_v34 }
 0x251   :  { %v1268_v36 = vpop.f32.mrf.mxu2 }
 0x252   :  { %v1269_v38 = vadd.f32 %v2312_v20, %v1268_v36 }
 0x254   :  { %1320 = vst [vmem:[#allocation2 + $0x98] sm:$0xff] %v1269_v38 }
 0x259   :  { %v1271_v39 = vpop.f32.mrf.mxu2 }
 0x25a   :  { %v1272_v41 = vadd.f32 %v2312_v20, %v1271_v39 }
 0x25c   :  { %1321 = vst [vmem:[#allocation2 + $0xa0] sm:$0xff] %v1272_v41 }
 0x261   :  { %v1273_v46 = vpop.f32.mrf.mxu2 }
 0x262   :  { %v1274_v49 = vadd.f32 %v2312_v20, %v1273_v46 }
 0x264   :  { %1322 = vst [vmem:[#allocation2 + $0xa8] sm:$0xff] %v1274_v49 }
 0x26f   :  { %v1276_v5 = vpop.f32.mrf.mxu2 }
 0x270   :  { %v1277_v23 = vadd.f32 %v2312_v20, %v1276_v5 }
 0x272   :  { %1323 = vst [vmem:[#allocation2 + $0xb0] sm:$0xff] %v1277_v23 }
 0x277   :  { %v1278_v35 = vpop.f32.mrf.mxu2 }
 0x278   :  { %v1279_v21 = vadd.f32 %v2312_v20, %v1278_v35 }
 0x27a   :  { %1324 = vst [vmem:[#allocation2 + $0xb8] sm:$0xff] %v1279_v21 }
 0x27f   :  { %v1281_v33 = vpop.f32.mrf.mxu3 }
 0x280   :  { %v1282_v47 = vadd.f32 %v2312_v20, %v1281_v33 }
 0x282   :  { %1325 = vst [vmem:[#allocation2 + $0xc0] sm:$0xff] %v1282_v47 }
 0x287   :  { %v1283_v37 = vpop.f32.mrf.mxu3 }
 0x288   :  { %v1284_v40 = vadd.f32 %v2312_v20, %v1283_v37 }
 0x28a   :  { %1326 = vst [vmem:[#allocation2 + $0xc8] sm:$0xff] %v1284_v40 }
 0x28f   :  { %v1286_v50 = vpop.f32.mrf.mxu3 }
 0x290   :  { %v1287_v32 = vadd.f32 %v2312_v20, %v1286_v50 }
 0x292   :  { %1327 = vst [vmem:[#allocation2 + $0xd0] sm:$0xff] %v1287_v32 }
 0x297   :  { %v1288_v45 = vpop.f32.mrf.mxu3 }
 0x298   :  { %v1289_v52 = vadd.f32 %v2312_v20, %v1288_v45 }
 0x29a   :  { %1328 = vst [vmem:[#allocation2 + $0xd8] sm:$0xff] %v1289_v52 }
 0x29f   :  { %v1291_v55 = vpop.f32.mrf.mxu3 }
 0x2a0   :  { %v1292_v54 = vadd.f32 %v2312_v20, %v1291_v55 }
 0x2a2   :  { %1329 = vst [vmem:[#allocation2 + $0xe0] sm:$0xff] %v1292_v54 }
 0x2a7   :  { %v1293_v58 = vpop.f32.mrf.mxu3 }
 0x2a8   :  { %v1294_v53 = vadd.f32 %v2312_v20, %v1293_v58 }
 0x2aa   :  { %1330 = vst [vmem:[#allocation2 + $0xe8] sm:$0xff] %v1294_v53 }
 0x2af   :  { %v1296_v59 = vpop.f32.mrf.mxu3 }
 0x2b0   :  { %v1297_v63 = vadd.f32 %v2312_v20, %v1296_v59 }
 0x2b2   :  { %1331 = vst [vmem:[#allocation2 + $0xf0] sm:$0xff] %v1297_v63 }
 0x2b7   :  { %v1298_v1 = vpop.f32.mrf.mxu3 }
 0x2b8   :  { %v1299_v61 = vadd.f32 %v2312_v20, %v1298_v1 }
 0x2ba   :  { %1332 = vst [vmem:[#allocation2 + $0xf8] sm:$0xff] %v1299_v61 }
 0x2bb   :  { %1345 = dma.vmem_to_hbm [thread:$0]  %s1338_s13, 4096, %s1340_s15, [#allocation3], %s1781_s2, %s1781_s2, %s1782_s16  }
 0x2bc   :  { %1777 = dma.done.wait [#allocation3], 4096  }
 0x2bd   :  { %1778 = vsyncadd [#allocation3], 4294963200 }
 0x2be   :  { %1350 = vsyncpa [#allocation3], 1 }

</bundles_post_ra>
